<compile_context>
chip_gen: v6e
topology: v6e:2x2x1
jax: 0.10.0
libtpu: 0.0.40
codegen_flags: <defaults>
</compile_context>

<pallas_src>
import functools

import jax
import jax.numpy as jnp
from jax import lax
from jax.experimental import pallas as pl
from jax.experimental.pallas import tpu as pltpu


# ----------------------------- Pallas kernel -------------------------------

def _convnet_kernel(x_ref, r1_ref, b1_ref, r2_ref, b2_ref,
                    w3_ref, b3_ref, w4_ref, b4_ref, o_ref,
                    xs1_ref, xs2_ref, *, nb, nk):
    # Spatial sizes implied by Linear(nk*4*4, 50): 28 -> 24 -> 12 -> 8 -> 4.
    KS = 5
    f32 = jnp.float32
    bf16 = jnp.bfloat16
    C1 = nk * 12                  # conv1 pooled lane width (per im2col tap)
    C2 = nk * 4                   # conv2 pooled lane width

    # ---- Conv1 im2col: 5 contiguous slab copies (rows ordered (oh1, b)) ----
    # x_ref rows are (h, b); output row (oh1, b) tap kh reads input row
    # (oh1 + kh, b) == global row (oh1 + kh)*nb + b  -> a contiguous window.
    for kh in range(KS):
        xs1_ref[:, kh * 28:(kh + 1) * 28] = x_ref[kh * nb:(kh + 24) * nb, :]

    # ---- Conv1 GEMM (bf16 operands, f32 accumulate): (24*nb, 140)x(140, nk*24)
    y1 = jnp.dot(xs1_ref[...], r1_ref[...], preferred_element_type=f32)

    # ---- Pool1 (2x2) + bias + ReLU, written straight into conv2 im2col ----
    # y1 rows are (oh1, b); columns are (ow_parity, co, pw).  Row pooling is a
    # max of two contiguous nb-row slabs, lane pooling a max of the two
    # contiguous lane halves.  Pooled row m feeds xs2 taps kh with oh2 = m-kh.
    b1 = b1_ref[...]                                   # (1, nk*12), f32
    for m in range(12):
        t = jnp.maximum(y1[(2 * m) * nb:(2 * m + 1) * nb, :],
                        y1[(2 * m + 1) * nb:(2 * m + 2) * nb, :])
        t = jnp.maximum(t[:, :C1], t[:, C1:])          # (nb, nk*12)
        p1m = jnp.maximum(t + b1, 0.0).astype(bf16)
        for kh in range(max(0, m - 7), min(KS - 1, m) + 1):
            oh2 = m - kh
            xs2_ref[oh2 * nb:(oh2 + 1) * nb, kh * C1:(kh + 1) * C1] = p1m

    # ---- Conv2 GEMM: (8*nb, 5*nk*12) x (5*nk*12, nk*8) ----
    y2 = jnp.dot(xs2_ref[...], r2_ref[...], preferred_element_type=f32)

    # ---- Pool2 + bias + ReLU, FC1 as 4 accumulated GEMMs (no flatten) ----
    b2 = b2_ref[...]                                   # (1, nk*4), f32
    h = None
    for m2 in range(4):                                # pooled row index (ph)
        t = jnp.maximum(y2[(2 * m2) * nb:(2 * m2 + 1) * nb, :],
                        y2[(2 * m2 + 1) * nb:(2 * m2 + 2) * nb, :])
        t = jnp.maximum(t[:, :C2], t[:, C2:])          # (nb, nk*4)
        p2m = jnp.maximum(t + b2, 0.0).astype(bf16)
        g = jnp.dot(p2m, w3_ref[m2 * C2:(m2 + 1) * C2, :],
                    preferred_element_type=f32)
        h = g if h is None else h + g

    # ---- FC1 bias/ReLU + FC2 ----
    h = jnp.maximum(h + b3_ref[...], 0.0)              # (nb, 50), f32
    out = jnp.dot(h.astype(bf16), w4_ref[...],
                  preferred_element_type=f32) + b4_ref[...]
    o_ref[...] = out.astype(o_ref.dtype)


# ----------------------------- JAX-side packing -----------------------------

def _pack_params(params):
    """Repack torch-layout params into the kernel's GEMM layouts (one-time)."""
    w1, b1, w2, b2, w3, b3, w4, b4 = params
    nk = w1.shape[0]
    hid = w3.shape[0]
    out = w4.shape[0]
    f32, bf16 = jnp.float32, jnp.bfloat16

    # Conv1 width-Toeplitz. rows = (kh, w); cols = (ow_parity, co, ow//2).
    s1 = (jnp.arange(28)[None, :, None]
          == (jnp.arange(24)[None, None, :]
              + jnp.arange(5)[:, None, None])).astype(f32)   # (kw, w, ow)
    r1 = jnp.einsum('ohk,kwp->hwop', w1[:, 0].astype(f32), s1)  # (5,28,nk,24)
    r1 = r1.reshape(5, 28, nk, 12, 2)
    r1 = jnp.transpose(r1, (0, 1, 4, 2, 3)).reshape(5 * 28, nk * 24)
    r1 = r1.astype(bf16)

    # Conv2. rows = (kh, c, w); cols = (ow_parity, co, ow//2).
    s2 = (jnp.arange(12)[None, :, None]
          == (jnp.arange(8)[None, None, :]
              + jnp.arange(5)[:, None, None])).astype(f32)    # (kw, w, ow)
    r2 = jnp.einsum('ochk,kwp->hcwop', w2.astype(f32), s2)     # (5,nk,12,nk,8)
    r2 = r2.reshape(5, nk, 12, nk, 4, 2)
    r2 = jnp.transpose(r2, (0, 1, 2, 5, 3, 4)).reshape(5 * nk * 12, nk * 8)
    r2 = r2.astype(bf16)

    # Biases in the POOLED column layout (co, pw): added after the 2x2 max.
    b1p = jnp.repeat(b1.astype(f32), 12).reshape(1, nk * 12)
    b2p = jnp.repeat(b2.astype(f32), 4).reshape(1, nk * 4)

    # Linear1: rows ordered (ph, co, pw) so the kernel can slice one (nk*4, hid)
    # block per pooled row (4 accumulated GEMMs == flatten-free FC1).
    w3p = jnp.transpose(w3.reshape(hid, nk, 4, 4).astype(f32), (2, 1, 3, 0))
    w3p = w3p.reshape(nk * 16, hid).astype(bf16)
    b3p = b3.reshape(1, hid).astype(f32)

    w4p = w4.T.astype(bf16)                                    # (hid, out)
    b4p = b4.reshape(1, out).astype(f32)
    return r1, b1p, r2, b2p, w3p, b3p, w4p, b4p


def _pick_nb(n):
    """Batch-block size: multiple of 8 (MXU/M alignment, out_spec rows),
    capped to keep the batched f32 conv1 output comfortably inside VMEM."""
    for cand in (64, 32, 16, 8):
        if n % cand == 0:
            return cand
    return n


def convnet_forward(x, params, *, block_batch=None):
    """x: (N, 1, 28, 28) float -> (N, output_size) float32."""
    w1 = params[0]
    nk = w1.shape[0]
    out_size = params[6].shape[0]
    n = x.shape[0]
    nb = _pick_nb(n) if block_batch is None else block_batch
    assert n % nb == 0, "batch must be divisible by the batch block"
    assert nb == n or nb % 8 == 0, "batch block must be a multiple of 8"
    grid_n = n // nb

    packed = _pack_params(params)

    # Host-side layout plumbing: per batch block, rows ordered (h, b), bf16.
    xb = x.reshape(grid_n, nb, 28, 28).transpose(0, 2, 1, 3)
    xb = xb.reshape(grid_n, 28 * nb, 28).astype(jnp.bfloat16)

    kernel = functools.partial(_convnet_kernel, nb=nb, nk=nk)
    in_specs = [pl.BlockSpec((None, 28 * nb, 28), lambda i: (i, 0, 0))]
    in_specs += [pl.BlockSpec(a.shape, lambda i: (0, 0)) for a in packed]

    return pl.pallas_call(
        kernel,
        out_shape=jax.ShapeDtypeStruct((n, out_size), jnp.float32),
        grid=(grid_n,),
        in_specs=in_specs,
        out_specs=pl.BlockSpec((nb, out_size), lambda i: (i, 0)),
        scratch_shapes=[
            pltpu.VMEM((24 * nb, 5 * 28), jnp.bfloat16),       # conv1 im2col
            pltpu.VMEM((8 * nb, 5 * nk * 12), jnp.bfloat16),   # conv2 im2col
        ],
        compiler_params=pltpu.CompilerParams(
            dimension_semantics=("parallel",)),
    )(xb, *packed)


# ----------------------------- reference & demo -----------------------------

def init_params(key, n_kernels, output_size):
    ks = jax.random.split(key, 8)
    s = 0.05
    w1 = s * jax.random.normal(ks[0], (n_kernels, 1, 5, 5), jnp.float32)
    b1 = s * jax.random.normal(ks[1], (n_kernels,), jnp.float32)
    w2 = s * jax.random.normal(ks[2], (n_kernels, n_kernels, 5, 5), jnp.float32)
    b2 = s * jax.random.normal(ks[3], (n_kernels,), jnp.float32)
    w3 = s * jax.random.normal(ks[4], (50, n_kernels * 4 * 4), jnp.float32)
    b3 = s * jax.random.normal(ks[5], (50,), jnp.float32)
    w4 = s * jax.random.normal(ks[6], (output_size, 50), jnp.float32)
    b4 = s * jax.random.normal(ks[7], (output_size,), jnp.float32)
    return (w1, b1, w2, b2, w3, b3, w4, b4)


def _reference_forward(x, params):
    """Pure-JAX (XLA) reference matching the PyTorch module."""
    w1, b1, w2, b2, w3, b3, w4, b4 = params
    dn = ('NCHW', 'OIHW', 'NCHW')
    y = lax.conv_general_dilated(x, w1, (1, 1), 'VALID', dimension_numbers=dn)
    y = jax.nn.relu(y + b1[None, :, None, None])
    y = lax.reduce_window(y, -jnp.inf, lax.max, (1, 1, 2, 2), (1, 1, 2, 2), 'VALID')
    y = lax.conv_general_dilated(y, w2, (1, 1), 'VALID', dimension_numbers=dn)
    y = jax.nn.relu(y + b2[None, :, None, None])
    y = lax.reduce_window(y, -jnp.inf, lax.max, (1, 1, 2, 2), (1, 1, 2, 2), 'VALID')
    y = y.reshape(y.shape[0], -1)
    y = jax.nn.relu(y @ w3.T + b3)
    return y @ w4.T + b4


if __name__ == "__main__":
    key = jax.random.PRNGKey(0)
    k_x, k_p = jax.random.split(key)

    batch = 2
    n_kernels = 8
    output_size = 10
    # Linear(n_kernels*4*4, 50) implies 28x28 input (28 -> 24 -> 12 -> 8 -> 4).
    x = jax.random.normal(k_x, (batch, 1, 28, 28), jnp.float32)
    params = init_params(k_p, n_kernels, output_size)

    fwd = jax.jit(convnet_forward)
    out = fwd(x, params)
    jax.block_until_ready(out)
    assert out.shape == (batch, output_size), out.shape

    # bf16-MXU vs f32 reference: generous tolerance.
    ref = _reference_forward(x, params)
    err = float(jnp.max(jnp.abs(out - ref)))
    assert err < 2e-2, f"max abs err vs reference: {err}"
    print("KERNEL_OK")
</pallas_src>

<mosaic_0001>
module attributes {stable_mosaic.version = 11 : i64} {
  func.func @_convnet_kernel(%arg0: i32, %arg1: memref<1x56x28xbf16, #tpu.memory_space<vmem>>, %arg2: memref<140x192xbf16, #tpu.memory_space<vmem>>, %arg3: memref<1x96xf32, #tpu.memory_space<vmem>>, %arg4: memref<480x64xbf16, #tpu.memory_space<vmem>>, %arg5: memref<1x32xf32, #tpu.memory_space<vmem>>, %arg6: memref<128x50xbf16, #tpu.memory_space<vmem>>, %arg7: memref<1x50xf32, #tpu.memory_space<vmem>>, %arg8: memref<50x10xbf16, #tpu.memory_space<vmem>>, %arg9: memref<1x10xf32, #tpu.memory_space<vmem>>, %arg10: memref<2x10xf32, #tpu.memory_space<vmem>>, %arg11: memref<48x140xbf16, #tpu.memory_space<vmem>>, %arg12: memref<16x480xbf16, #tpu.memory_space<vmem>>) attributes {dimension_semantics = [#tpu.dimension_semantics<parallel>], iteration_bounds = array<i64: 1>, scalar_prefetch = 0 : i64, scratch_operands = 2 : i64, tpu.core_type = #tpu.core_type<tc>, window_params = [{transform_indices = @transform_0, window_bounds = array<i64: 1, 56, 28>}, {pipeline_mode = #tpu.pipeline_mode<synchronous>, transform_indices = @transform_1, window_bounds = array<i64: 140, 192>}, {pipeline_mode = #tpu.pipeline_mode<synchronous>, transform_indices = @transform_2, window_bounds = array<i64: 1, 96>}, {pipeline_mode = #tpu.pipeline_mode<synchronous>, transform_indices = @transform_3, window_bounds = array<i64: 480, 64>}, {pipeline_mode = #tpu.pipeline_mode<synchronous>, transform_indices = @transform_4, window_bounds = array<i64: 1, 32>}, {pipeline_mode = #tpu.pipeline_mode<synchronous>, transform_indices = @transform_5, window_bounds = array<i64: 128, 50>}, {pipeline_mode = #tpu.pipeline_mode<synchronous>, transform_indices = @transform_6, window_bounds = array<i64: 1, 50>}, {pipeline_mode = #tpu.pipeline_mode<synchronous>, transform_indices = @transform_7, window_bounds = array<i64: 50, 10>}, {pipeline_mode = #tpu.pipeline_mode<synchronous>, transform_indices = @transform_8, window_bounds = array<i64: 1, 10>}, {transform_indices = @transform_9, window_bounds = array<i64: 2, 10>}]} {
    %c0 = arith.constant 0 : index
    %c0_0 = arith.constant 0 : index
    %c0_1 = arith.constant 0 : index
    %0 = vector.load %arg1[%c0, %c0_0, %c0_1] : memref<1x56x28xbf16, #tpu.memory_space<vmem>>, vector<1x48x28xbf16>
    %1 = vector.shape_cast %0 : vector<1x48x28xbf16> to vector<48x28xbf16>
    %c0_2 = arith.constant 0 : index
    %c0_3 = arith.constant 0 : index
    %2 = vector.load %arg11[%c0_2, %c0_3] : memref<48x140xbf16, #tpu.memory_space<vmem>>, vector<48x28xbf16>
    tpu.vector_store %arg11[%c0_2, %c0_3], %1 {strides = array<i32>} : memref<48x140xbf16, #tpu.memory_space<vmem>>, vector<48x28xbf16>,
    %c0_4 = arith.constant 0 : index
    %c2 = arith.constant 2 : index
    %c0_5 = arith.constant 0 : index
    %3 = vector.load %arg1[%c0_4, %c2, %c0_5] : memref<1x56x28xbf16, #tpu.memory_space<vmem>>, vector<1x48x28xbf16>
    %4 = vector.shape_cast %3 : vector<1x48x28xbf16> to vector<48x28xbf16>
    %c0_6 = arith.constant 0 : index
    %c28 = arith.constant 28 : index
    %5 = vector.load %arg11[%c0_6, %c28] : memref<48x140xbf16, #tpu.memory_space<vmem>>, vector<48x28xbf16>
    tpu.vector_store %arg11[%c0_6, %c28], %4 {strides = array<i32>} : memref<48x140xbf16, #tpu.memory_space<vmem>>, vector<48x28xbf16>,
    %c0_7 = arith.constant 0 : index
    %c4 = arith.constant 4 : index
    %c0_8 = arith.constant 0 : index
    %6 = vector.load %arg1[%c0_7, %c4, %c0_8] : memref<1x56x28xbf16, #tpu.memory_space<vmem>>, vector<1x48x28xbf16>
    %7 = vector.shape_cast %6 : vector<1x48x28xbf16> to vector<48x28xbf16>
    %c0_9 = arith.constant 0 : index
    %c56 = arith.constant 56 : index
    %8 = vector.load %arg11[%c0_9, %c56] : memref<48x140xbf16, #tpu.memory_space<vmem>>, vector<48x28xbf16>
    tpu.vector_store %arg11[%c0_9, %c56], %7 {strides = array<i32>} : memref<48x140xbf16, #tpu.memory_space<vmem>>, vector<48x28xbf16>,
    %c0_10 = arith.constant 0 : index
    %c6 = arith.constant 6 : index
    %c0_11 = arith.constant 0 : index
    %9 = vector.load %arg1[%c0_10, %c6, %c0_11] : memref<1x56x28xbf16, #tpu.memory_space<vmem>>, vector<1x48x28xbf16>
    %10 = vector.shape_cast %9 : vector<1x48x28xbf16> to vector<48x28xbf16>
    %c0_12 = arith.constant 0 : index
    %c84 = arith.constant 84 : index
    %11 = vector.load %arg11[%c0_12, %c84] : memref<48x140xbf16, #tpu.memory_space<vmem>>, vector<48x28xbf16>
    tpu.vector_store %arg11[%c0_12, %c84], %10 {strides = array<i32>} : memref<48x140xbf16, #tpu.memory_space<vmem>>, vector<48x28xbf16>,
    %c0_13 = arith.constant 0 : index
    %c8 = arith.constant 8 : index
    %c0_14 = arith.constant 0 : index
    %12 = vector.load %arg1[%c0_13, %c8, %c0_14] : memref<1x56x28xbf16, #tpu.memory_space<vmem>>, vector<1x48x28xbf16>
    %13 = vector.shape_cast %12 : vector<1x48x28xbf16> to vector<48x28xbf16>
    %c0_15 = arith.constant 0 : index
    %c112 = arith.constant 112 : index
    %14 = vector.load %arg11[%c0_15, %c112] : memref<48x140xbf16, #tpu.memory_space<vmem>>, vector<48x28xbf16>
    tpu.vector_store %arg11[%c0_15, %c112], %13 {strides = array<i32>} : memref<48x140xbf16, #tpu.memory_space<vmem>>, vector<48x28xbf16>,
    %c0_16 = arith.constant 0 : index
    %c0_17 = arith.constant 0 : index
    %15 = vector.load %arg11[%c0_16, %c0_17] : memref<48x140xbf16, #tpu.memory_space<vmem>>, vector<48x140xbf16>
    %c0_18 = arith.constant 0 : index
    %c0_19 = arith.constant 0 : index
    %16 = vector.load %arg2[%c0_18, %c0_19] : memref<140x192xbf16, #tpu.memory_space<vmem>>, vector<140x192xbf16>
    %cst = arith.constant dense<0.000000e+00> : vector<48x192xf32>
    %17 = tpu.matmul %15, %16, %cst {dimension_numbers = #tpu.dot_dimension_numbers<[1], [0], [0], [1], [0, 0, 1, 1], [], []>} : vector<48x140xbf16>, vector<140x192xbf16>, vector<48x192xf32> -> vector<48x192xf32>
    %c0_20 = arith.constant 0 : index
    %c0_21 = arith.constant 0 : index
    %18 = vector.load %arg3[%c0_20, %c0_21] : memref<1x96xf32, #tpu.memory_space<vmem>>, vector<1x96xf32>
    %19 = vector.extract_strided_slice %17 {offsets = [0, 0], sizes = [2, 192], strides = [1, 1]} : vector<48x192xf32> to vector<2x192xf32>
    %20 = vector.extract_strided_slice %17 {offsets = [2, 0], sizes = [2, 192], strides = [1, 1]} : vector<48x192xf32> to vector<2x192xf32>
    %21 = arith.maximumf %19, %20 : vector<2x192xf32>
    %22 = vector.extract_strided_slice %21 {offsets = [0, 0], sizes = [2, 96], strides = [1, 1]} : vector<2x192xf32> to vector<2x96xf32>
    %23 = vector.extract_strided_slice %21 {offsets = [0, 96], sizes = [2, 96], strides = [1, 1]} : vector<2x192xf32> to vector<2x96xf32>
    %24 = arith.maximumf %22, %23 : vector<2x96xf32>
    %25 = vector.broadcast %18 : vector<1x96xf32> to vector<2x96xf32>
    %26 = arith.addf %24, %25 : vector<2x96xf32>
    %cst_22 = arith.constant 0.000000e+00 : f32
    %27 = vector.broadcast %cst_22 : f32 to vector<2x96xf32>
    %28 = arith.maximumf %26, %27 : vector<2x96xf32>
    %29 = arith.truncf %28 : vector<2x96xf32> to vector<2x96xbf16>
    %c0_23 = arith.constant 0 : index
    %c0_24 = arith.constant 0 : index
    %30 = vector.load %arg12[%c0_23, %c0_24] : memref<16x480xbf16, #tpu.memory_space<vmem>>, vector<2x96xbf16>
    tpu.vector_store %arg12[%c0_23, %c0_24], %29 {strides = array<i32>} : memref<16x480xbf16, #tpu.memory_space<vmem>>, vector<2x96xbf16>,
    %31 = vector.extract_strided_slice %17 {offsets = [4, 0], sizes = [2, 192], strides = [1, 1]} : vector<48x192xf32> to vector<2x192xf32>
    %32 = vector.extract_strided_slice %17 {offsets = [6, 0], sizes = [2, 192], strides = [1, 1]} : vector<48x192xf32> to vector<2x192xf32>
    %33 = arith.maximumf %31, %32 : vector<2x192xf32>
    %34 = vector.extract_strided_slice %33 {offsets = [0, 0], sizes = [2, 96], strides = [1, 1]} : vector<2x192xf32> to vector<2x96xf32>
    %35 = vector.extract_strided_slice %33 {offsets = [0, 96], sizes = [2, 96], strides = [1, 1]} : vector<2x192xf32> to vector<2x96xf32>
    %36 = arith.maximumf %34, %35 : vector<2x96xf32>
    %37 = vector.broadcast %18 : vector<1x96xf32> to vector<2x96xf32>
    %38 = arith.addf %36, %37 : vector<2x96xf32>
    %cst_25 = arith.constant 0.000000e+00 : f32
    %39 = vector.broadcast %cst_25 : f32 to vector<2x96xf32>
    %40 = arith.maximumf %38, %39 : vector<2x96xf32>
    %41 = arith.truncf %40 : vector<2x96xf32> to vector<2x96xbf16>
    %c2_26 = arith.constant 2 : index
    %c0_27 = arith.constant 0 : index
    %42 = vector.load %arg12[%c2_26, %c0_27] : memref<16x480xbf16, #tpu.memory_space<vmem>>, vector<2x96xbf16>
    tpu.vector_store %arg12[%c2_26, %c0_27], %41 {strides = array<i32>} : memref<16x480xbf16, #tpu.memory_space<vmem>>, vector<2x96xbf16>,
    %c0_28 = arith.constant 0 : index
    %c96 = arith.constant 96 : index
    %43 = vector.load %arg12[%c0_28, %c96] : memref<16x480xbf16, #tpu.memory_space<vmem>>, vector<2x96xbf16>
    tpu.vector_store %arg12[%c0_28, %c96], %41 {strides = array<i32>} : memref<16x480xbf16, #tpu.memory_space<vmem>>, vector<2x96xbf16>,
    %44 = vector.extract_strided_slice %17 {offsets = [8, 0], sizes = [2, 192], strides = [1, 1]} : vector<48x192xf32> to vector<2x192xf32>
    %45 = vector.extract_strided_slice %17 {offsets = [10, 0], sizes = [2, 192], strides = [1, 1]} : vector<48x192xf32> to vector<2x192xf32>
    %46 = arith.maximumf %44, %45 : vector<2x192xf32>
    %47 = vector.extract_strided_slice %46 {offsets = [0, 0], sizes = [2, 96], strides = [1, 1]} : vector<2x192xf32> to vector<2x96xf32>
    %48 = vector.extract_strided_slice %46 {offsets = [0, 96], sizes = [2, 96], strides = [1, 1]} : vector<2x192xf32> to vector<2x96xf32>
    %49 = arith.maximumf %47, %48 : vector<2x96xf32>
    %50 = vector.broadcast %18 : vector<1x96xf32> to vector<2x96xf32>
    %51 = arith.addf %49, %50 : vector<2x96xf32>
    %cst_29 = arith.constant 0.000000e+00 : f32
    %52 = vector.broadcast %cst_29 : f32 to vector<2x96xf32>
    %53 = arith.maximumf %51, %52 : vector<2x96xf32>
    %54 = arith.truncf %53 : vector<2x96xf32> to vector<2x96xbf16>
    %c4_30 = arith.constant 4 : index
    %c0_31 = arith.constant 0 : index
    %55 = vector.load %arg12[%c4_30, %c0_31] : memref<16x480xbf16, #tpu.memory_space<vmem>>, vector<2x96xbf16>
    tpu.vector_store %arg12[%c4_30, %c0_31], %54 {strides = array<i32>} : memref<16x480xbf16, #tpu.memory_space<vmem>>, vector<2x96xbf16>,
    %c2_32 = arith.constant 2 : index
    %c96_33 = arith.constant 96 : index
    %56 = vector.load %arg12[%c2_32, %c96_33] : memref<16x480xbf16, #tpu.memory_space<vmem>>, vector<2x96xbf16>
    tpu.vector_store %arg12[%c2_32, %c96_33], %54 {strides = array<i32>} : memref<16x480xbf16, #tpu.memory_space<vmem>>, vector<2x96xbf16>,
    %c0_34 = arith.constant 0 : index
    %c192 = arith.constant 192 : index
    %57 = vector.load %arg12[%c0_34, %c192] : memref<16x480xbf16, #tpu.memory_space<vmem>>, vector<2x96xbf16>
    tpu.vector_store %arg12[%c0_34, %c192], %54 {strides = array<i32>} : memref<16x480xbf16, #tpu.memory_space<vmem>>, vector<2x96xbf16>,
    %58 = vector.extract_strided_slice %17 {offsets = [12, 0], sizes = [2, 192], strides = [1, 1]} : vector<48x192xf32> to vector<2x192xf32>
    %59 = vector.extract_strided_slice %17 {offsets = [14, 0], sizes = [2, 192], strides = [1, 1]} : vector<48x192xf32> to vector<2x192xf32>
    %60 = arith.maximumf %58, %59 : vector<2x192xf32>
    %61 = vector.extract_strided_slice %60 {offsets = [0, 0], sizes = [2, 96], strides = [1, 1]} : vector<2x192xf32> to vector<2x96xf32>
    %62 = vector.extract_strided_slice %60 {offsets = [0, 96], sizes = [2, 96], strides = [1, 1]} : vector<2x192xf32> to vector<2x96xf32>
    %63 = arith.maximumf %61, %62 : vector<2x96xf32>
    %64 = vector.broadcast %18 : vector<1x96xf32> to vector<2x96xf32>
    %65 = arith.addf %63, %64 : vector<2x96xf32>
    %cst_35 = arith.constant 0.000000e+00 : f32
    %66 = vector.broadcast %cst_35 : f32 to vector<2x96xf32>
    %67 = arith.maximumf %65, %66 : vector<2x96xf32>
    %68 = arith.truncf %67 : vector<2x96xf32> to vector<2x96xbf16>
    %c6_36 = arith.constant 6 : index
    %c0_37 = arith.constant 0 : index
    %69 = vector.load %arg12[%c6_36, %c0_37] : memref<16x480xbf16, #tpu.memory_space<vmem>>, vector<2x96xbf16>
    tpu.vector_store %arg12[%c6_36, %c0_37], %68 {strides = array<i32>} : memref<16x480xbf16, #tpu.memory_space<vmem>>, vector<2x96xbf16>,
    %c4_38 = arith.constant 4 : index
    %c96_39 = arith.constant 96 : index
    %70 = vector.load %arg12[%c4_38, %c96_39] : memref<16x480xbf16, #tpu.memory_space<vmem>>, vector<2x96xbf16>
    tpu.vector_store %arg12[%c4_38, %c96_39], %68 {strides = array<i32>} : memref<16x480xbf16, #tpu.memory_space<vmem>>, vector<2x96xbf16>,
    %c2_40 = arith.constant 2 : index
    %c192_41 = arith.constant 192 : index
    %71 = vector.load %arg12[%c2_40, %c192_41] : memref<16x480xbf16, #tpu.memory_space<vmem>>, vector<2x96xbf16>
    tpu.vector_store %arg12[%c2_40, %c192_41], %68 {strides = array<i32>} : memref<16x480xbf16, #tpu.memory_space<vmem>>, vector<2x96xbf16>,
    %c0_42 = arith.constant 0 : index
    %c288 = arith.constant 288 : index
    %72 = vector.load %arg12[%c0_42, %c288] : memref<16x480xbf16, #tpu.memory_space<vmem>>, vector<2x96xbf16>
    tpu.vector_store %arg12[%c0_42, %c288], %68 {strides = array<i32>} : memref<16x480xbf16, #tpu.memory_space<vmem>>, vector<2x96xbf16>,
    %73 = vector.extract_strided_slice %17 {offsets = [16, 0], sizes = [2, 192], strides = [1, 1]} : vector<48x192xf32> to vector<2x192xf32>
    %74 = vector.extract_strided_slice %17 {offsets = [18, 0], sizes = [2, 192], strides = [1, 1]} : vector<48x192xf32> to vector<2x192xf32>
    %75 = arith.maximumf %73, %74 : vector<2x192xf32>
    %76 = vector.extract_strided_slice %75 {offsets = [0, 0], sizes = [2, 96], strides = [1, 1]} : vector<2x192xf32> to vector<2x96xf32>
    %77 = vector.extract_strided_slice %75 {offsets = [0, 96], sizes = [2, 96], strides = [1, 1]} : vector<2x192xf32> to vector<2x96xf32>
    %78 = arith.maximumf %76, %77 : vector<2x96xf32>
    %79 = vector.broadcast %18 : vector<1x96xf32> to vector<2x96xf32>
    %80 = arith.addf %78, %79 : vector<2x96xf32>
    %cst_43 = arith.constant 0.000000e+00 : f32
    %81 = vector.broadcast %cst_43 : f32 to vector<2x96xf32>
    %82 = arith.maximumf %80, %81 : vector<2x96xf32>
    %83 = arith.truncf %82 : vector<2x96xf32> to vector<2x96xbf16>
    %c8_44 = arith.constant 8 : index
    %c0_45 = arith.constant 0 : index
    %84 = vector.load %arg12[%c8_44, %c0_45] : memref<16x480xbf16, #tpu.memory_space<vmem>>, vector<2x96xbf16>
    tpu.vector_store %arg12[%c8_44, %c0_45], %83 {strides = array<i32>} : memref<16x480xbf16, #tpu.memory_space<vmem>>, vector<2x96xbf16>,
    %c6_46 = arith.constant 6 : index
    %c96_47 = arith.constant 96 : index
    %85 = vector.load %arg12[%c6_46, %c96_47] : memref<16x480xbf16, #tpu.memory_space<vmem>>, vector<2x96xbf16>
    tpu.vector_store %arg12[%c6_46, %c96_47], %83 {strides = array<i32>} : memref<16x480xbf16, #tpu.memory_space<vmem>>, vector<2x96xbf16>,
    %c4_48 = arith.constant 4 : index
    %c192_49 = arith.constant 192 : index
    %86 = vector.load %arg12[%c4_48, %c192_49] : memref<16x480xbf16, #tpu.memory_space<vmem>>, vector<2x96xbf16>
    tpu.vector_store %arg12[%c4_48, %c192_49], %83 {strides = array<i32>} : memref<16x480xbf16, #tpu.memory_space<vmem>>, vector<2x96xbf16>,
    %c2_50 = arith.constant 2 : index
    %c288_51 = arith.constant 288 : index
    %87 = vector.load %arg12[%c2_50, %c288_51] : memref<16x480xbf16, #tpu.memory_space<vmem>>, vector<2x96xbf16>
    tpu.vector_store %arg12[%c2_50, %c288_51], %83 {strides = array<i32>} : memref<16x480xbf16, #tpu.memory_space<vmem>>, vector<2x96xbf16>,
    %c0_52 = arith.constant 0 : index
    %c384 = arith.constant 384 : index
    %88 = vector.load %arg12[%c0_52, %c384] : memref<16x480xbf16, #tpu.memory_space<vmem>>, vector<2x96xbf16>
    tpu.vector_store %arg12[%c0_52, %c384], %83 {strides = array<i32>} : memref<16x480xbf16, #tpu.memory_space<vmem>>, vector<2x96xbf16>,
    %89 = vector.extract_strided_slice %17 {offsets = [20, 0], sizes = [2, 192], strides = [1, 1]} : vector<48x192xf32> to vector<2x192xf32>
    %90 = vector.extract_strided_slice %17 {offsets = [22, 0], sizes = [2, 192], strides = [1, 1]} : vector<48x192xf32> to vector<2x192xf32>
    %91 = arith.maximumf %89, %90 : vector<2x192xf32>
    %92 = vector.extract_strided_slice %91 {offsets = [0, 0], sizes = [2, 96], strides = [1, 1]} : vector<2x192xf32> to vector<2x96xf32>
    %93 = vector.extract_strided_slice %91 {offsets = [0, 96], sizes = [2, 96], strides = [1, 1]} : vector<2x192xf32> to vector<2x96xf32>
    %94 = arith.maximumf %92, %93 : vector<2x96xf32>
    %95 = vector.broadcast %18 : vector<1x96xf32> to vector<2x96xf32>
    %96 = arith.addf %94, %95 : vector<2x96xf32>
    %cst_53 = arith.constant 0.000000e+00 : f32
    %97 = vector.broadcast %cst_53 : f32 to vector<2x96xf32>
    %98 = arith.maximumf %96, %97 : vector<2x96xf32>
    %99 = arith.truncf %98 : vector<2x96xf32> to vector<2x96xbf16>
    %c10 = arith.constant 10 : index
    %c0_54 = arith.constant 0 : index
    %100 = vector.load %arg12[%c10, %c0_54] : memref<16x480xbf16, #tpu.memory_space<vmem>>, vector<2x96xbf16>
    tpu.vector_store %arg12[%c10, %c0_54], %99 {strides = array<i32>} : memref<16x480xbf16, #tpu.memory_space<vmem>>, vector<2x96xbf16>,
    %c8_55 = arith.constant 8 : index
    %c96_56 = arith.constant 96 : index
    %101 = vector.load %arg12[%c8_55, %c96_56] : memref<16x480xbf16, #tpu.memory_space<vmem>>, vector<2x96xbf16>
    tpu.vector_store %arg12[%c8_55, %c96_56], %99 {strides = array<i32>} : memref<16x480xbf16, #tpu.memory_space<vmem>>, vector<2x96xbf16>,
    %c6_57 = arith.constant 6 : index
    %c192_58 = arith.constant 192 : index
    %102 = vector.load %arg12[%c6_57, %c192_58] : memref<16x480xbf16, #tpu.memory_space<vmem>>, vector<2x96xbf16>
    tpu.vector_store %arg12[%c6_57, %c192_58], %99 {strides = array<i32>} : memref<16x480xbf16, #tpu.memory_space<vmem>>, vector<2x96xbf16>,
    %c4_59 = arith.constant 4 : index
    %c288_60 = arith.constant 288 : index
    %103 = vector.load %arg12[%c4_59, %c288_60] : memref<16x480xbf16, #tpu.memory_space<vmem>>, vector<2x96xbf16>
    tpu.vector_store %arg12[%c4_59, %c288_60], %99 {strides = array<i32>} : memref<16x480xbf16, #tpu.memory_space<vmem>>, vector<2x96xbf16>,
    %c2_61 = arith.constant 2 : index
    %c384_62 = arith.constant 384 : index
    %104 = vector.load %arg12[%c2_61, %c384_62] : memref<16x480xbf16, #tpu.memory_space<vmem>>, vector<2x96xbf16>
    tpu.vector_store %arg12[%c2_61, %c384_62], %99 {strides = array<i32>} : memref<16x480xbf16, #tpu.memory_space<vmem>>, vector<2x96xbf16>,
    %105 = vector.extract_strided_slice %17 {offsets = [24, 0], sizes = [2, 192], strides = [1, 1]} : vector<48x192xf32> to vector<2x192xf32>
    %106 = vector.extract_strided_slice %17 {offsets = [26, 0], sizes = [2, 192], strides = [1, 1]} : vector<48x192xf32> to vector<2x192xf32>
    %107 = arith.maximumf %105, %106 : vector<2x192xf32>
    %108 = vector.extract_strided_slice %107 {offsets = [0, 0], sizes = [2, 96], strides = [1, 1]} : vector<2x192xf32> to vector<2x96xf32>
    %109 = vector.extract_strided_slice %107 {offsets = [0, 96], sizes = [2, 96], strides = [1, 1]} : vector<2x192xf32> to vector<2x96xf32>
    %110 = arith.maximumf %108, %109 : vector<2x96xf32>
    %111 = vector.broadcast %18 : vector<1x96xf32> to vector<2x96xf32>
    %112 = arith.addf %110, %111 : vector<2x96xf32>
    %cst_63 = arith.constant 0.000000e+00 : f32
    %113 = vector.broadcast %cst_63 : f32 to vector<2x96xf32>
    %114 = arith.maximumf %112, %113 : vector<2x96xf32>
    %115 = arith.truncf %114 : vector<2x96xf32> to vector<2x96xbf16>
    %c12 = arith.constant 12 : index
    %c0_64 = arith.constant 0 : index
    %116 = vector.load %arg12[%c12, %c0_64] : memref<16x480xbf16, #tpu.memory_space<vmem>>, vector<2x96xbf16>
    tpu.vector_store %arg12[%c12, %c0_64], %115 {strides = array<i32>} : memref<16x480xbf16, #tpu.memory_space<vmem>>, vector<2x96xbf16>,
    %c10_65 = arith.constant 10 : index
    %c96_66 = arith.constant 96 : index
    %117 = vector.load %arg12[%c10_65, %c96_66] : memref<16x480xbf16, #tpu.memory_space<vmem>>, vector<2x96xbf16>
    tpu.vector_store %arg12[%c10_65, %c96_66], %115 {strides = array<i32>} : memref<16x480xbf16, #tpu.memory_space<vmem>>, vector<2x96xbf16>,
    %c8_67 = arith.constant 8 : index
    %c192_68 = arith.constant 192 : index
    %118 = vector.load %arg12[%c8_67, %c192_68] : memref<16x480xbf16, #tpu.memory_space<vmem>>, vector<2x96xbf16>
    tpu.vector_store %arg12[%c8_67, %c192_68], %115 {strides = array<i32>} : memref<16x480xbf16, #tpu.memory_space<vmem>>, vector<2x96xbf16>,
    %c6_69 = arith.constant 6 : index
    %c288_70 = arith.constant 288 : index
    %119 = vector.load %arg12[%c6_69, %c288_70] : memref<16x480xbf16, #tpu.memory_space<vmem>>, vector<2x96xbf16>
    tpu.vector_store %arg12[%c6_69, %c288_70], %115 {strides = array<i32>} : memref<16x480xbf16, #tpu.memory_space<vmem>>, vector<2x96xbf16>,
    %c4_71 = arith.constant 4 : index
    %c384_72 = arith.constant 384 : index
    %120 = vector.load %arg12[%c4_71, %c384_72] : memref<16x480xbf16, #tpu.memory_space<vmem>>, vector<2x96xbf16>
    tpu.vector_store %arg12[%c4_71, %c384_72], %115 {strides = array<i32>} : memref<16x480xbf16, #tpu.memory_space<vmem>>, vector<2x96xbf16>,
    %121 = vector.extract_strided_slice %17 {offsets = [28, 0], sizes = [2, 192], strides = [1, 1]} : vector<48x192xf32> to vector<2x192xf32>
    %122 = vector.extract_strided_slice %17 {offsets = [30, 0], sizes = [2, 192], strides = [1, 1]} : vector<48x192xf32> to vector<2x192xf32>
    %123 = arith.maximumf %121, %122 : vector<2x192xf32>
    %124 = vector.extract_strided_slice %123 {offsets = [0, 0], sizes = [2, 96], strides = [1, 1]} : vector<2x192xf32> to vector<2x96xf32>
    %125 = vector.extract_strided_slice %123 {offsets = [0, 96], sizes = [2, 96], strides = [1, 1]} : vector<2x192xf32> to vector<2x96xf32>
    %126 = arith.maximumf %124, %125 : vector<2x96xf32>
    %127 = vector.broadcast %18 : vector<1x96xf32> to vector<2x96xf32>
    %128 = arith.addf %126, %127 : vector<2x96xf32>
    %cst_73 = arith.constant 0.000000e+00 : f32
    %129 = vector.broadcast %cst_73 : f32 to vector<2x96xf32>
    %130 = arith.maximumf %128, %129 : vector<2x96xf32>
    %131 = arith.truncf %130 : vector<2x96xf32> to vector<2x96xbf16>
    %c14 = arith.constant 14 : index
    %c0_74 = arith.constant 0 : index
    %132 = vector.load %arg12[%c14, %c0_74] : memref<16x480xbf16, #tpu.memory_space<vmem>>, vector<2x96xbf16>
    tpu.vector_store %arg12[%c14, %c0_74], %131 {strides = array<i32>} : memref<16x480xbf16, #tpu.memory_space<vmem>>, vector<2x96xbf16>,
    %c12_75 = arith.constant 12 : index
    %c96_76 = arith.constant 96 : index
    %133 = vector.load %arg12[%c12_75, %c96_76] : memref<16x480xbf16, #tpu.memory_space<vmem>>, vector<2x96xbf16>
    tpu.vector_store %arg12[%c12_75, %c96_76], %131 {strides = array<i32>} : memref<16x480xbf16, #tpu.memory_space<vmem>>, vector<2x96xbf16>,
    %c10_77 = arith.constant 10 : index
    %c192_78 = arith.constant 192 : index
    %134 = vector.load %arg12[%c10_77, %c192_78] : memref<16x480xbf16, #tpu.memory_space<vmem>>, vector<2x96xbf16>
    tpu.vector_store %arg12[%c10_77, %c192_78], %131 {strides = array<i32>} : memref<16x480xbf16, #tpu.memory_space<vmem>>, vector<2x96xbf16>,
    %c8_79 = arith.constant 8 : index
    %c288_80 = arith.constant 288 : index
    %135 = vector.load %arg12[%c8_79, %c288_80] : memref<16x480xbf16, #tpu.memory_space<vmem>>, vector<2x96xbf16>
    tpu.vector_store %arg12[%c8_79, %c288_80], %131 {strides = array<i32>} : memref<16x480xbf16, #tpu.memory_space<vmem>>, vector<2x96xbf16>,
    %c6_81 = arith.constant 6 : index
    %c384_82 = arith.constant 384 : index
    %136 = vector.load %arg12[%c6_81, %c384_82] : memref<16x480xbf16, #tpu.memory_space<vmem>>, vector<2x96xbf16>
    tpu.vector_store %arg12[%c6_81, %c384_82], %131 {strides = array<i32>} : memref<16x480xbf16, #tpu.memory_space<vmem>>, vector<2x96xbf16>,
    %137 = vector.extract_strided_slice %17 {offsets = [32, 0], sizes = [2, 192], strides = [1, 1]} : vector<48x192xf32> to vector<2x192xf32>
    %138 = vector.extract_strided_slice %17 {offsets = [34, 0], sizes = [2, 192], strides = [1, 1]} : vector<48x192xf32> to vector<2x192xf32>
    %139 = arith.maximumf %137, %138 : vector<2x192xf32>
    %140 = vector.extract_strided_slice %139 {offsets = [0, 0], sizes = [2, 96], strides = [1, 1]} : vector<2x192xf32> to vector<2x96xf32>
    %141 = vector.extract_strided_slice %139 {offsets = [0, 96], sizes = [2, 96], strides = [1, 1]} : vector<2x192xf32> to vector<2x96xf32>
    %142 = arith.maximumf %140, %141 : vector<2x96xf32>
    %143 = vector.broadcast %18 : vector<1x96xf32> to vector<2x96xf32>
    %144 = arith.addf %142, %143 : vector<2x96xf32>
    %cst_83 = arith.constant 0.000000e+00 : f32
    %145 = vector.broadcast %cst_83 : f32 to vector<2x96xf32>
    %146 = arith.maximumf %144, %145 : vector<2x96xf32>
    %147 = arith.truncf %146 : vector<2x96xf32> to vector<2x96xbf16>
    %c14_84 = arith.constant 14 : index
    %c96_85 = arith.constant 96 : index
    %148 = vector.load %arg12[%c14_84, %c96_85] : memref<16x480xbf16, #tpu.memory_space<vmem>>, vector<2x96xbf16>
    tpu.vector_store %arg12[%c14_84, %c96_85], %147 {strides = array<i32>} : memref<16x480xbf16, #tpu.memory_space<vmem>>, vector<2x96xbf16>,
    %c12_86 = arith.constant 12 : index
    %c192_87 = arith.constant 192 : index
    %149 = vector.load %arg12[%c12_86, %c192_87] : memref<16x480xbf16, #tpu.memory_space<vmem>>, vector<2x96xbf16>
    tpu.vector_store %arg12[%c12_86, %c192_87], %147 {strides = array<i32>} : memref<16x480xbf16, #tpu.memory_space<vmem>>, vector<2x96xbf16>,
    %c10_88 = arith.constant 10 : index
    %c288_89 = arith.constant 288 : index
    %150 = vector.load %arg12[%c10_88, %c288_89] : memref<16x480xbf16, #tpu.memory_space<vmem>>, vector<2x96xbf16>
    tpu.vector_store %arg12[%c10_88, %c288_89], %147 {strides = array<i32>} : memref<16x480xbf16, #tpu.memory_space<vmem>>, vector<2x96xbf16>,
    %c8_90 = arith.constant 8 : index
    %c384_91 = arith.constant 384 : index
    %151 = vector.load %arg12[%c8_90, %c384_91] : memref<16x480xbf16, #tpu.memory_space<vmem>>, vector<2x96xbf16>
    tpu.vector_store %arg12[%c8_90, %c384_91], %147 {strides = array<i32>} : memref<16x480xbf16, #tpu.memory_space<vmem>>, vector<2x96xbf16>,
    %152 = vector.extract_strided_slice %17 {offsets = [36, 0], sizes = [2, 192], strides = [1, 1]} : vector<48x192xf32> to vector<2x192xf32>
    %153 = vector.extract_strided_slice %17 {offsets = [38, 0], sizes = [2, 192], strides = [1, 1]} : vector<48x192xf32> to vector<2x192xf32>
    %154 = arith.maximumf %152, %153 : vector<2x192xf32>
    %155 = vector.extract_strided_slice %154 {offsets = [0, 0], sizes = [2, 96], strides = [1, 1]} : vector<2x192xf32> to vector<2x96xf32>
    %156 = vector.extract_strided_slice %154 {offsets = [0, 96], sizes = [2, 96], strides = [1, 1]} : vector<2x192xf32> to vector<2x96xf32>
    %157 = arith.maximumf %155, %156 : vector<2x96xf32>
    %158 = vector.broadcast %18 : vector<1x96xf32> to vector<2x96xf32>
    %159 = arith.addf %157, %158 : vector<2x96xf32>
    %cst_92 = arith.constant 0.000000e+00 : f32
    %160 = vector.broadcast %cst_92 : f32 to vector<2x96xf32>
    %161 = arith.maximumf %159, %160 : vector<2x96xf32>
    %162 = arith.truncf %161 : vector<2x96xf32> to vector<2x96xbf16>
    %c14_93 = arith.constant 14 : index
    %c192_94 = arith.constant 192 : index
    %163 = vector.load %arg12[%c14_93, %c192_94] : memref<16x480xbf16, #tpu.memory_space<vmem>>, vector<2x96xbf16>
    tpu.vector_store %arg12[%c14_93, %c192_94], %162 {strides = array<i32>} : memref<16x480xbf16, #tpu.memory_space<vmem>>, vector<2x96xbf16>,
    %c12_95 = arith.constant 12 : index
    %c288_96 = arith.constant 288 : index
    %164 = vector.load %arg12[%c12_95, %c288_96] : memref<16x480xbf16, #tpu.memory_space<vmem>>, vector<2x96xbf16>
    tpu.vector_store %arg12[%c12_95, %c288_96], %162 {strides = array<i32>} : memref<16x480xbf16, #tpu.memory_space<vmem>>, vector<2x96xbf16>,
    %c10_97 = arith.constant 10 : index
    %c384_98 = arith.constant 384 : index
    %165 = vector.load %arg12[%c10_97, %c384_98] : memref<16x480xbf16, #tpu.memory_space<vmem>>, vector<2x96xbf16>
    tpu.vector_store %arg12[%c10_97, %c384_98], %162 {strides = array<i32>} : memref<16x480xbf16, #tpu.memory_space<vmem>>, vector<2x96xbf16>,
    %166 = vector.extract_strided_slice %17 {offsets = [40, 0], sizes = [2, 192], strides = [1, 1]} : vector<48x192xf32> to vector<2x192xf32>
    %167 = vector.extract_strided_slice %17 {offsets = [42, 0], sizes = [2, 192], strides = [1, 1]} : vector<48x192xf32> to vector<2x192xf32>
    %168 = arith.maximumf %166, %167 : vector<2x192xf32>
    %169 = vector.extract_strided_slice %168 {offsets = [0, 0], sizes = [2, 96], strides = [1, 1]} : vector<2x192xf32> to vector<2x96xf32>
    %170 = vector.extract_strided_slice %168 {offsets = [0, 96], sizes = [2, 96], strides = [1, 1]} : vector<2x192xf32> to vector<2x96xf32>
    %171 = arith.maximumf %169, %170 : vector<2x96xf32>
    %172 = vector.broadcast %18 : vector<1x96xf32> to vector<2x96xf32>
    %173 = arith.addf %171, %172 : vector<2x96xf32>
    %cst_99 = arith.constant 0.000000e+00 : f32
    %174 = vector.broadcast %cst_99 : f32 to vector<2x96xf32>
    %175 = arith.maximumf %173, %174 : vector<2x96xf32>
    %176 = arith.truncf %175 : vector<2x96xf32> to vector<2x96xbf16>
    %c14_100 = arith.constant 14 : index
    %c288_101 = arith.constant 288 : index
    %177 = vector.load %arg12[%c14_100, %c288_101] : memref<16x480xbf16, #tpu.memory_space<vmem>>, vector<2x96xbf16>
    tpu.vector_store %arg12[%c14_100, %c288_101], %176 {strides = array<i32>} : memref<16x480xbf16, #tpu.memory_space<vmem>>, vector<2x96xbf16>,
    %c12_102 = arith.constant 12 : index
    %c384_103 = arith.constant 384 : index
    %178 = vector.load %arg12[%c12_102, %c384_103] : memref<16x480xbf16, #tpu.memory_space<vmem>>, vector<2x96xbf16>
    tpu.vector_store %arg12[%c12_102, %c384_103], %176 {strides = array<i32>} : memref<16x480xbf16, #tpu.memory_space<vmem>>, vector<2x96xbf16>,
    %179 = vector.extract_strided_slice %17 {offsets = [44, 0], sizes = [2, 192], strides = [1, 1]} : vector<48x192xf32> to vector<2x192xf32>
    %180 = vector.extract_strided_slice %17 {offsets = [46, 0], sizes = [2, 192], strides = [1, 1]} : vector<48x192xf32> to vector<2x192xf32>
    %181 = arith.maximumf %179, %180 : vector<2x192xf32>
    %182 = vector.extract_strided_slice %181 {offsets = [0, 0], sizes = [2, 96], strides = [1, 1]} : vector<2x192xf32> to vector<2x96xf32>
    %183 = vector.extract_strided_slice %181 {offsets = [0, 96], sizes = [2, 96], strides = [1, 1]} : vector<2x192xf32> to vector<2x96xf32>
    %184 = arith.maximumf %182, %183 : vector<2x96xf32>
    %185 = vector.broadcast %18 : vector<1x96xf32> to vector<2x96xf32>
    %186 = arith.addf %184, %185 : vector<2x96xf32>
    %cst_104 = arith.constant 0.000000e+00 : f32
    %187 = vector.broadcast %cst_104 : f32 to vector<2x96xf32>
    %188 = arith.maximumf %186, %187 : vector<2x96xf32>
    %189 = arith.truncf %188 : vector<2x96xf32> to vector<2x96xbf16>
    %c14_105 = arith.constant 14 : index
    %c384_106 = arith.constant 384 : index
    %190 = vector.load %arg12[%c14_105, %c384_106] : memref<16x480xbf16, #tpu.memory_space<vmem>>, vector<2x96xbf16>
    tpu.vector_store %arg12[%c14_105, %c384_106], %189 {strides = array<i32>} : memref<16x480xbf16, #tpu.memory_space<vmem>>, vector<2x96xbf16>,
    %c0_107 = arith.constant 0 : index
    %c0_108 = arith.constant 0 : index
    %191 = vector.load %arg12[%c0_107, %c0_108] : memref<16x480xbf16, #tpu.memory_space<vmem>>, vector<16x480xbf16>
    %c0_109 = arith.constant 0 : index
    %c0_110 = arith.constant 0 : index
    %192 = vector.load %arg4[%c0_109, %c0_110] : memref<480x64xbf16, #tpu.memory_space<vmem>>, vector<480x64xbf16>
    %cst_111 = arith.constant dense<0.000000e+00> : vector<16x64xf32>
    %193 = tpu.matmul %191, %192, %cst_111 {dimension_numbers = #tpu.dot_dimension_numbers<[1], [0], [0], [1], [0, 0, 1, 1], [], []>} : vector<16x480xbf16>, vector<480x64xbf16>, vector<16x64xf32> -> vector<16x64xf32>
    %c0_112 = arith.constant 0 : index
    %c0_113 = arith.constant 0 : index
    %194 = vector.load %arg5[%c0_112, %c0_113] : memref<1x32xf32, #tpu.memory_space<vmem>>, vector<1x32xf32>
    %195 = vector.extract_strided_slice %193 {offsets = [0, 0], sizes = [2, 64], strides = [1, 1]} : vector<16x64xf32> to vector<2x64xf32>
    %196 = vector.extract_strided_slice %193 {offsets = [2, 0], sizes = [2, 64], strides = [1, 1]} : vector<16x64xf32> to vector<2x64xf32>
    %197 = arith.maximumf %195, %196 : vector<2x64xf32>
    %198 = vector.extract_strided_slice %197 {offsets = [0, 0], sizes = [2, 32], strides = [1, 1]} : vector<2x64xf32> to vector<2x32xf32>
    %199 = vector.extract_strided_slice %197 {offsets = [0, 32], sizes = [2, 32], strides = [1, 1]} : vector<2x64xf32> to vector<2x32xf32>
    %200 = arith.maximumf %198, %199 : vector<2x32xf32>
    %201 = vector.broadcast %194 : vector<1x32xf32> to vector<2x32xf32>
    %202 = arith.addf %200, %201 : vector<2x32xf32>
    %cst_114 = arith.constant 0.000000e+00 : f32
    %203 = vector.broadcast %cst_114 : f32 to vector<2x32xf32>
    %204 = arith.maximumf %202, %203 : vector<2x32xf32>
    %205 = arith.truncf %204 : vector<2x32xf32> to vector<2x32xbf16>
    %c0_115 = arith.constant 0 : index
    %c0_116 = arith.constant 0 : index
    %206 = vector.load %arg6[%c0_115, %c0_116] : memref<128x50xbf16, #tpu.memory_space<vmem>>, vector<32x50xbf16>
    %cst_117 = arith.constant dense<0.000000e+00> : vector<2x50xf32>
    %207 = tpu.matmul %205, %206, %cst_117 {dimension_numbers = #tpu.dot_dimension_numbers<[1], [0], [0], [1], [0, 0, 1, 1], [], []>} : vector<2x32xbf16>, vector<32x50xbf16>, vector<2x50xf32> -> vector<2x50xf32>
    %208 = vector.extract_strided_slice %193 {offsets = [4, 0], sizes = [2, 64], strides = [1, 1]} : vector<16x64xf32> to vector<2x64xf32>
    %209 = vector.extract_strided_slice %193 {offsets = [6, 0], sizes = [2, 64], strides = [1, 1]} : vector<16x64xf32> to vector<2x64xf32>
    %210 = arith.maximumf %208, %209 : vector<2x64xf32>
    %211 = vector.extract_strided_slice %210 {offsets = [0, 0], sizes = [2, 32], strides = [1, 1]} : vector<2x64xf32> to vector<2x32xf32>
    %212 = vector.extract_strided_slice %210 {offsets = [0, 32], sizes = [2, 32], strides = [1, 1]} : vector<2x64xf32> to vector<2x32xf32>
    %213 = arith.maximumf %211, %212 : vector<2x32xf32>
    %214 = vector.broadcast %194 : vector<1x32xf32> to vector<2x32xf32>
    %215 = arith.addf %213, %214 : vector<2x32xf32>
    %cst_118 = arith.constant 0.000000e+00 : f32
    %216 = vector.broadcast %cst_118 : f32 to vector<2x32xf32>
    %217 = arith.maximumf %215, %216 : vector<2x32xf32>
    %218 = arith.truncf %217 : vector<2x32xf32> to vector<2x32xbf16>
    %c32 = arith.constant 32 : index
    %c0_119 = arith.constant 0 : index
    %219 = vector.load %arg6[%c32, %c0_119] : memref<128x50xbf16, #tpu.memory_space<vmem>>, vector<32x50xbf16>
    %cst_120 = arith.constant dense<0.000000e+00> : vector<2x50xf32>
    %220 = tpu.matmul %218, %219, %cst_120 {dimension_numbers = #tpu.dot_dimension_numbers<[1], [0], [0], [1], [0, 0, 1, 1], [], []>} : vector<2x32xbf16>, vector<32x50xbf16>, vector<2x50xf32> -> vector<2x50xf32>
    %221 = arith.addf %207, %220 : vector<2x50xf32>
    %222 = vector.extract_strided_slice %193 {offsets = [8, 0], sizes = [2, 64], strides = [1, 1]} : vector<16x64xf32> to vector<2x64xf32>
    %223 = vector.extract_strided_slice %193 {offsets = [10, 0], sizes = [2, 64], strides = [1, 1]} : vector<16x64xf32> to vector<2x64xf32>
    %224 = arith.maximumf %222, %223 : vector<2x64xf32>
    %225 = vector.extract_strided_slice %224 {offsets = [0, 0], sizes = [2, 32], strides = [1, 1]} : vector<2x64xf32> to vector<2x32xf32>
    %226 = vector.extract_strided_slice %224 {offsets = [0, 32], sizes = [2, 32], strides = [1, 1]} : vector<2x64xf32> to vector<2x32xf32>
    %227 = arith.maximumf %225, %226 : vector<2x32xf32>
    %228 = vector.broadcast %194 : vector<1x32xf32> to vector<2x32xf32>
    %229 = arith.addf %227, %228 : vector<2x32xf32>
    %cst_121 = arith.constant 0.000000e+00 : f32
    %230 = vector.broadcast %cst_121 : f32 to vector<2x32xf32>
    %231 = arith.maximumf %229, %230 : vector<2x32xf32>
    %232 = arith.truncf %231 : vector<2x32xf32> to vector<2x32xbf16>
    %c64 = arith.constant 64 : index
    %c0_122 = arith.constant 0 : index
    %233 = vector.load %arg6[%c64, %c0_122] : memref<128x50xbf16, #tpu.memory_space<vmem>>, vector<32x50xbf16>
    %cst_123 = arith.constant dense<0.000000e+00> : vector<2x50xf32>
    %234 = tpu.matmul %232, %233, %cst_123 {dimension_numbers = #tpu.dot_dimension_numbers<[1], [0], [0], [1], [0, 0, 1, 1], [], []>} : vector<2x32xbf16>, vector<32x50xbf16>, vector<2x50xf32> -> vector<2x50xf32>
    %235 = arith.addf %221, %234 : vector<2x50xf32>
    %236 = vector.extract_strided_slice %193 {offsets = [12, 0], sizes = [2, 64], strides = [1, 1]} : vector<16x64xf32> to vector<2x64xf32>
    %237 = vector.extract_strided_slice %193 {offsets = [14, 0], sizes = [2, 64], strides = [1, 1]} : vector<16x64xf32> to vector<2x64xf32>
    %238 = arith.maximumf %236, %237 : vector<2x64xf32>
    %239 = vector.extract_strided_slice %238 {offsets = [0, 0], sizes = [2, 32], strides = [1, 1]} : vector<2x64xf32> to vector<2x32xf32>
    %240 = vector.extract_strided_slice %238 {offsets = [0, 32], sizes = [2, 32], strides = [1, 1]} : vector<2x64xf32> to vector<2x32xf32>
    %241 = arith.maximumf %239, %240 : vector<2x32xf32>
    %242 = vector.broadcast %194 : vector<1x32xf32> to vector<2x32xf32>
    %243 = arith.addf %241, %242 : vector<2x32xf32>
    %cst_124 = arith.constant 0.000000e+00 : f32
    %244 = vector.broadcast %cst_124 : f32 to vector<2x32xf32>
    %245 = arith.maximumf %243, %244 : vector<2x32xf32>
    %246 = arith.truncf %245 : vector<2x32xf32> to vector<2x32xbf16>
    %c96_125 = arith.constant 96 : index
    %c0_126 = arith.constant 0 : index
    %247 = vector.load %arg6[%c96_125, %c0_126] : memref<128x50xbf16, #tpu.memory_space<vmem>>, vector<32x50xbf16>
    %cst_127 = arith.constant dense<0.000000e+00> : vector<2x50xf32>
    %248 = tpu.matmul %246, %247, %cst_127 {dimension_numbers = #tpu.dot_dimension_numbers<[1], [0], [0], [1], [0, 0, 1, 1], [], []>} : vector<2x32xbf16>, vector<32x50xbf16>, vector<2x50xf32> -> vector<2x50xf32>
    %249 = arith.addf %235, %248 : vector<2x50xf32>
    %c0_128 = arith.constant 0 : index
    %c0_129 = arith.constant 0 : index
    %250 = vector.load %arg7[%c0_128, %c0_129] : memref<1x50xf32, #tpu.memory_space<vmem>>, vector<1x50xf32>
    %251 = vector.broadcast %250 : vector<1x50xf32> to vector<2x50xf32>
    %252 = arith.addf %249, %251 : vector<2x50xf32>
    %cst_130 = arith.constant 0.000000e+00 : f32
    %253 = vector.broadcast %cst_130 : f32 to vector<2x50xf32>
    %254 = arith.maximumf %252, %253 : vector<2x50xf32>
    %255 = arith.truncf %254 : vector<2x50xf32> to vector<2x50xbf16>
    %c0_131 = arith.constant 0 : index
    %c0_132 = arith.constant 0 : index
    %256 = vector.load %arg8[%c0_131, %c0_132] : memref<50x10xbf16, #tpu.memory_space<vmem>>, vector<50x10xbf16>
    %cst_133 = arith.constant dense<0.000000e+00> : vector<2x10xf32>
    %257 = tpu.matmul %255, %256, %cst_133 {dimension_numbers = #tpu.dot_dimension_numbers<[1], [0], [0], [1], [0, 0, 1, 1], [], []>} : vector<2x50xbf16>, vector<50x10xbf16>, vector<2x10xf32> -> vector<2x10xf32>
    %c0_134 = arith.constant 0 : index
    %c0_135 = arith.constant 0 : index
    %258 = vector.load %arg9[%c0_134, %c0_135] : memref<1x10xf32, #tpu.memory_space<vmem>>, vector<1x10xf32>
    %259 = vector.broadcast %258 : vector<1x10xf32> to vector<2x10xf32>
    %260 = arith.addf %257, %259 : vector<2x10xf32>
    %c0_136 = arith.constant 0 : index
    %c0_137 = arith.constant 0 : index
    %261 = vector.load %arg10[%c0_136, %c0_137] : memref<2x10xf32, #tpu.memory_space<vmem>>, vector<2x10xf32>
    tpu.vector_store %arg10[%c0_136, %c0_137], %260 {strides = array<i32>} : memref<2x10xf32, #tpu.memory_space<vmem>>, vector<2x10xf32>,
    return
  }
  func.func @transform_0(%arg0: i32) -> (i32, i32, i32) {
    %c0_i32 = arith.constant 0 : i32
    %c0_i32_0 = arith.constant 0 : i32
    %c0_i32_1 = arith.constant 0 : i32
    return %arg0, %c0_i32, %c0_i32_0 : i32, i32, i32
  }
  func.func @transform_1(%arg0: i32) -> (i32, i32) {
    %c0_i32 = arith.constant 0 : i32
    %c0_i32_0 = arith.constant 0 : i32
    %c0_i32_1 = arith.constant 0 : i32
    return %c0_i32, %c0_i32_0 : i32, i32
  }
  func.func @transform_2(%arg0: i32) -> (i32, i32) {
    %c0_i32 = arith.constant 0 : i32
    %c0_i32_0 = arith.constant 0 : i32
    %c0_i32_1 = arith.constant 0 : i32
    return %c0_i32, %c0_i32_0 : i32, i32
  }
  func.func @transform_3(%arg0: i32) -> (i32, i32) {
    %c0_i32 = arith.constant 0 : i32
    %c0_i32_0 = arith.constant 0 : i32
    %c0_i32_1 = arith.constant 0 : i32
    return %c0_i32, %c0_i32_0 : i32, i32
  }
  func.func @transform_4(%arg0: i32) -> (i32, i32) {
    %c0_i32 = arith.constant 0 : i32
    %c0_i32_0 = arith.constant 0 : i32
    %c0_i32_1 = arith.constant 0 : i32
    return %c0_i32, %c0_i32_0 : i32, i32
  }
  func.func @transform_5(%arg0: i32) -> (i32, i32) {
    %c0_i32 = arith.constant 0 : i32
    %c0_i32_0 = arith.constant 0 : i32
    %c0_i32_1 = arith.constant 0 : i32
    return %c0_i32, %c0_i32_0 : i32, i32
  }
  func.func @transform_6(%arg0: i32) -> (i32, i32) {
    %c0_i32 = arith.constant 0 : i32
    %c0_i32_0 = arith.constant 0 : i32
    %c0_i32_1 = arith.constant 0 : i32
    return %c0_i32, %c0_i32_0 : i32, i32
  }
  func.func @transform_7(%arg0: i32) -> (i32, i32) {
    %c0_i32 = arith.constant 0 : i32
    %c0_i32_0 = arith.constant 0 : i32
    %c0_i32_1 = arith.constant 0 : i32
    return %c0_i32, %c0_i32_0 : i32, i32
  }
  func.func @transform_8(%arg0: i32) -> (i32, i32) {
    %c0_i32 = arith.constant 0 : i32
    %c0_i32_0 = arith.constant 0 : i32
    %c0_i32_1 = arith.constant 0 : i32
    return %c0_i32, %c0_i32_0 : i32, i32
  }
  func.func @transform_9(%arg0: i32) -> (i32, i32) {
    %c0_i32 = arith.constant 0 : i32
    %c0_i32_0 = arith.constant 0 : i32
    return %arg0, %c0_i32 : i32, i32
  }
}

</mosaic_0001>

<bundles_post_ra>
// kernel: convnet_forward.1
= control target key start
LH: loop header
LB: loop body
LE: loop exit
PB: predicated region body
PF: predicated region fallthrough
CT: control target
= control target key end

     0   :  { %vm61_vm0 = vcmask 1042432   ;;  %s1888_s13 = smov 112   ;;  %vm62_vm1 = vcmask 1046532   ;;  %vm122_vm2 = vcmask 1041408   ;;  %vm123_vm4 = vcmask 1045508   ;;  %s1889_s26 = smov 28   ;;  %s2646_s0 = inlined_call_operand.vmem [shape: bf16[1,56,28], index: 0, kind: input, shape index: {}]   ;;  %s2647_s1 = inlined_call_operand.vmem [shape: bf16[140,192], index: 1, kind: input, shape index: {}]   ;;  %s2648_s2 = inlined_call_operand.vmem [shape: f32[1,96], index: 2, kind: input, shape index: {}]   ;;  %s2649_s3 = inlined_call_operand.vmem [shape: bf16[480,64], index: 3, kind: input, shape index: {}]   ;;  %s2650_s4 = inlined_call_operand.vmem [shape: f32[1,32], index: 4, kind: input, shape index: {}]   ;;  %s2651_s5 = inlined_call_operand.vmem [shape: bf16[128,50], index: 5, kind: input, shape index: {}]   ;;  %s2652_s6 = inlined_call_operand.vmem [shape: f32[1,50], index: 6, kind: input, shape index: {}]   ;;  %s2653_s7 = inlined_call_operand.vmem [shape: bf16[50,10], index: 7, kind: input, shape index: {}]   ;;  %s2654_s8 = inlined_call_operand.vmem [shape: f32[1,10], index: 8, kind: input, shape index: {}]   ;;  %s2655_s9 = inlined_call_operand.hbm [shape: f32[2,10], index: 9, kind: output, shape index: {}]  }
   0x1   :  { %v230_v0 = vld [vmem:[%s2646_s0 + $0x4] sm:$0xf]  ;;  %v47_v1 = vld [vmem:[%s2646_s0] sm:$0xe]  ;;  %vm1959_vm3 = vmor %vm61_vm0, %vm62_vm1  ;;  %vm2656_vm6 = vcmask 1040384   ;;  %vm184_vm7 = vcmask 1044484  }
   0x2   :  { %242 = vrot.lane.b32.xlu1 %v230_v0, %s1888_s13  ;;  %v48_v2 = vld [vmem:[%s2646_s0 + $0x4] sm:$0xf]  ;;  %v1591_v3 = vrot.slane %v47_v1, 9  ;;  %v231_v6 = vld [vmem:[%s2646_s0 + $0x8] sm:$0xf]  ;;  %vm1986_vm5 = vmor %vm122_vm2, %vm123_vm4  ;;  %s1890_s17 = smov 56  }
   0x3   :  { %v66_v5 = vrot.slane %v48_v2, 5  ;;  %v49_v7 = vld [vmem:[%s2646_s0 + $0x8] sm:$0xf]  ;;  %v109_v9 = vld [vmem:[%s2646_s0 + $0x4] sm:$0xf]  ;;  %vm2004_vm8 = vmor %vm2656_vm6, %vm184_vm7  ;;  %s1891_s20 = smov 84  }
   0x4   :  { %v69_v8 = vrot.slane %v49_v7, 5  ;;  %v1975_v10 = vld [vmem:[%s2646_s0 + $0x8] sm:$0xf]  ;;  %v127_v13 = vrot.slane %v109_v9, 6  ;;  %v108_v15 = vld [vmem:[%s2646_s0] sm:$0xc] }
   0x5   :  { %v67_v11 = vsel %vm1959_vm3, %v1591_v3, %v66_v5  ;;  %v68_v12 = vrot.slane %v66_v5, 4  ;;  %v130_v14 = vrot.slane %v1975_v10, 6  ;;  %v1592_v17 = vrot.slane %v108_v15, 10  ;;  %v170_v18 = vld [vmem:[%s2646_s0 + $0x4] sm:$0xf]  ;;  %v294_v15 = vld [vmem:[%s2647_s1 + $0x30] sm:$0xff] }
   0x6   :  { %83 = vrot.lane.b32.xlu0 %v67_v11, %s1889_s26  ;;  %244 = vrot.lane.b32.xlu1 %v231_v6, %s1888_s13  ;;  %v1996_v19 = vld [vmem:[%s2646_s0 + $0x8] sm:$0xf]  ;;  %v129_v21 = vrot.slane %v127_v13, 4  ;;  %v188_v22 = vrot.slane %v170_v18, 7  ;;  %v169_v23 = vld [vmem:[%s2646_s0] sm:$0x8] }
   0x7   :  { %v70_v20 = vsel %vm1959_vm3, %v68_v12, %v69_v8  ;;  %v191_v25 = vrot.slane %v1996_v19, 7  ;;  %v50_v26 = vld [vmem:[%s2646_s0 + $0xc] sm:$0xf]  ;;  %v2015_v27 = vld [vmem:[%s2646_s0 + $0x10] sm:$0xf]  ;;  %v128_v31 = vsel %vm1986_vm5, %v1592_v17, %v127_v13  ;;  %v1593_v33 = vrot.slane %v169_v23, 11 }
   0x8   :  { %v131_v28 = vsel %vm1986_vm5, %v129_v21, %v130_v14  ;;  %v190_v29 = vrot.slane %v188_v22, 4  ;;  %v72_v30 = vrot.slane %v50_v26, 5  ;;  %v75_v35 = vrot.slane %v2015_v27, 5  ;;  %v111_v36 = vld [vmem:[%s2646_s0 + $0xc] sm:$0xf]  ;;  %v295_v17 = vld [vmem:[%s2647_s1 + $0x38] sm:$0xff] }
   0x9   :  { %v189_v37 = vsel %vm2004_vm8, %v1593_v33, %v188_v22  ;;  %v71_v39 = vrot.slane %v69_v8, 4  ;;  %v133_v40 = vrot.slane %v111_v36, 6  ;;  %v112_v41 = vld [vmem:[%s2646_s0 + $0x10] sm:$0xf]  ;;  %v2041_v42 = vld [vmem:[%s2646_s0 + $0xc] sm:$0xf] }
   0xa   :  { %85 = vrot.lane.b32.xlu0 %v70_v20, %s1889_s26  ;;  %146 = vrot.lane.b32.xlu1 %v131_v28, %s1890_s17  ;;  %v192_v32 = vsel %vm2004_vm8, %v190_v29, %v191_v25  ;;  %v74_v34 = vrot.slane %v72_v30, 4  ;;  %v233_v43 = vld [vmem:[%s2646_s0 + $0x10] sm:$0xf]  ;;  %v1787_v45 = vld [vmem:[%s2647_s1 + $0x74] ss:$8 sps:$4 sm:$0xff]   ;;  %v136_v49 = vrot.slane %v112_v41, 6 }
   0xb   :  { %v2049_v44 = vld [vmem:[%s2646_s0 + $0x10] sm:$0xf]  ;;  %v73_v47 = vsel %vm1959_vm3, %v71_v39, %v72_v30  ;;  %v135_v48 = vrot.slane %v133_v40, 4  ;;  %v194_v50 = vrot.slane %v2041_v42, 7  ;;  %v1790_v51 = vld [vmem:[%s2647_s1 + $0x64] ss:$8 sps:$4 sm:$0xff]   ;;  %438 = vmatprep.subr.bf16.mxu0 %v1787_v45 }
   0xc   :  { %v76_v38 = vsel %vm1959_vm3, %v74_v34, %v75_v35  ;;  %v1789_v46 = vld [vmem:[%s2647_s1 + $0x70] ss:$8 sps:$4 sm:$0xff]   ;;  %v2068_v52 = vld [vmem:[%s2646_s0 + $0x14] sm:$0xf]  ;;  %v1792_v53 = vld [vmem:[%s2647_s1 + $0x60] ss:$8 sps:$4 sm:$0xff]  }
   0xd   :  { %439 = vmatpush1.bf16.msra.mxu0 %v1789_v46  ;;  %v34_v54 = vld [vmem:[%s2646_s0] sm:$0xf]  ;;  %vm40_vm9 = vcmask 224256   ;;  %v232_v55 = vld [vmem:[%s2646_s0 + $0xc] sm:$0xf]  ;;  %v132_v56 = vrot.slane %v130_v14, 4  ;;  %v137_v59 = vsel %vm1986_vm5, %v135_v48, %v136_v49 }
   0xe   :  { %144 = vrot.lane.b32.xlu0 %v128_v31, %s1890_s17  ;;  %207 = vrot.lane.b32.xlu1 %v192_v32, %s1891_s20  ;;  %v197_v57 = vrot.slane %v2049_v44, 7  ;;  %v53_v58 = vld [vmem:[%s2646_s0 + $0x18] sm:$0x1]  ;;  %41 = vst.msk [vmem:[#allocation2] sm:$0xf] %vm40_vm9, %v34_v54  ;;  %v196_v60 = vrot.slane %v194_v50, 4  ;;  %v1606_v31 = vcombine.low %v294_v15, %v295_v17 }
   0xf   :  { %v78_v61 = vrot.slane %v2068_v52, 5  ;;  %440 = vmatprep.subr.bf16.mxu0 %v1790_v51  ;;  %v1793_v62 = vld [vmem:[%s2647_s1 + $0x54] ss:$8 sps:$4 sm:$0xff]   ;;  %v35_v63 = vld [vmem:[%s2646_s0 + $0x4] sm:$0xf]  ;;  %v193_v1 = vrot.slane %v191_v25, 4  ;;  %v134_v6 = vsel %vm1986_vm5, %v132_v56, %v133_v40 }
  0x10   :  { %42 = vst.msk [vmem:[#allocation2 + $0x8] sm:$0xf] %vm40_vm9, %v35_v63  ;;  %v1795_v0 = vld [vmem:[%s2647_s1 + $0x50] ss:$8 sps:$4 sm:$0xff]   ;;  %v81_v2 = vrot.slane %v53_v58, 5  ;;  %v198_v7 = vsel %vm2004_vm8, %v196_v60, %v197_v57  ;;  %v77_v13 = vrot.slane %v75_v35, 4 }
  0x11   :  { %441 = vmatpush1.bf16.msra.mxu0 %v1792_v53  ;;  %v2104_v3 = vld [vmem:[%s2646_s0 + $0x14] sm:$0xf]  ;;  %v1796_v5 = vld [vmem:[%s2647_s1 + $0x44] ss:$8 sps:$4 sm:$0xff]   ;;  %v80_v8 = vrot.slane %v78_v61, 4  ;;  %v138_v20 = vrot.slane %v136_v49, 4  ;;  %v195_v23 = vsel %vm2004_vm8, %v193_v1, %v194_v50 }
  0x12   :  { %205 = vrot.lane.b32.xlu0 %v189_v37, %s1891_s20  ;;  %89 = vrot.lane.b32.xlu1 %v76_v38, %s1889_s26  ;;  %v37_v9 = vld [vmem:[%s2646_s0 + $0xc] sm:$0xf]  ;;  %v36_v10 = vld [vmem:[%s2646_s0 + $0x8] sm:$0xf]  ;;  %v139_v19 = vrot.slane %v2104_v3, 6  ;;  %v79_v35 = vsel %vm1959_vm3, %v77_v13, %v78_v61  ;;  %v199_v48 = vrot.slane %v197_v57, 4 }
  0x13   :  { %442 = vmatprep.subr.bf16.mxu0 %v1793_v62  ;;  %v114_v11 = vld [vmem:[%s2646_s0 + $0x18] sm:$0x3]  ;;  %v1798_v12 = vld [vmem:[%s2647_s1 + $0x40] ss:$8 sps:$4 sm:$0xff]   ;;  %44 = vst.msk [vmem:[#allocation2 + $0x18] sm:$0xf] %vm40_vm9, %v37_v9  ;;  %v82_v25 = vsel %vm1959_vm3, %v80_v8, %v81_v2 }
  0x14   :  { %43 = vst.msk [vmem:[#allocation2 + $0x10] sm:$0xf] %vm40_vm9, %v36_v10  ;;  %v2132_v14 = vld [vmem:[%s2646_s0 + $0x14] sm:$0xf]  ;;  %v38_v22 = vld [vmem:[%s2646_s0 + $0x10] sm:$0xf]  ;;  %v140_v50 = vsel %vm1986_vm5, %v138_v20, %v139_v19 }
  0x15   :  { %443 = vmatpush1.bf16.msra.mxu0 %v1795_v0  ;;  %v1799_v18 = vld [vmem:[%s2647_s1 + $0x34] ss:$8 sps:$4 sm:$0xff]   ;;  %45 = vst.msk [vmem:[#allocation2 + $0x20] sm:$0xf] %vm40_vm9, %v38_v22  ;;  %v142_v26 = vrot.slane %v114_v11, 6  ;;  %v292_v27 = vld [vmem:[%s2647_s1 + $0x20] sm:$0xff] }
  0x16   :  { %87 = vrot.lane.b32.xlu0 %v73_v47, %s1889_s26  ;;  %248 = vrot.lane.b32.xlu1 %v233_v43, %s1888_s13  ;;  %v39_v21 = vld [vmem:[%s2646_s0 + $0x14] sm:$0xf]  ;;  %v293_v28 = vld [vmem:[%s2647_s1 + $0x28] sm:$0xff]  ;;  %v141_v33 = vrot.slane %v139_v19, 4  ;;  %v200_v34 = vrot.slane %v2132_v14, 7  ;;  %vm431_vm10 = vcmask 1045504  }
  0x17   :  { %444 = vmatprep.subr.bf16.mxu0 %v1796_v5  ;;  %46 = vst.msk [vmem:[#allocation2 + $0x28] sm:$0xf] %vm40_vm9, %v39_v21  ;;  %v235_v29 = vld [vmem:[%s2646_s0 + $0x18] sm:$0xf]  ;;  %v1801_v32 = vld [vmem:[%s2647_s1 + $0x24] ss:$8 sps:$4 sm:$0xff]   ;;  %v1604_v39 = vcombine.low %v292_v27, %v293_v28 }
  0x18   :  { %v175_v30 = vld [vmem:[%s2646_s0 + $0x18] sm:$0x7]  ;;  %v290_v36 = vld [vmem:[%s2647_s1 + $0x10] sm:$0xff]  ;;  %v304_v40 = vld [vmem:[%s2647_s1 + $0x80] sm:$0xff]  ;;  %v202_v42 = vrot.slane %v200_v34, 4  ;;  %v143_v45 = vsel %vm1986_vm5, %v141_v33, %v142_v26  ;;  %v201_v16 = vsel %vm2004_vm8, %v199_v48, %v200_v34 }
  0x19   :  { %445 = vmatpush1.bf16.msra.mxu0 %v1798_v12  ;;  %v291_v37 = vld [vmem:[%s2647_s1 + $0x18] sm:$0xff]  ;;  %v234_v38 = vld [vmem:[%s2646_s0 + $0x14] sm:$0xf]  ;;  %v305_v41 = vld [vmem:[%s2647_s1 + $0x88] sm:$0x33]  ;;  %v203_v43 = vrot.slane %v175_v30, 7 }
  0x1a   :  { %246 = vrot.lane.b32.xlu0 %v232_v55, %s1888_s13  ;;  %150 = vrot.lane.b32.xlu1 %v137_v59, %s1890_s17  ;;  %v1803_v4 = vld [vmem:[%s2647_s1 + $0x14] ss:$8 sps:$4 sm:$0xff]   ;;  %v1602_v46 = vcombine.low %v290_v36, %v291_v37  ;;  %v1805_v47 = vld [vmem:[%s2647_s1 + $0x4] ss:$8 sps:$4 sm:$0xff]   ;;  %v1616_v49 = vcombine.low %v304_v40, %v305_v41 }
  0x1b   :  { %446 = vmatprep.subr.bf16.mxu0 %v1799_v18  ;;  %v204_v51 = vsel %vm2004_vm8, %v202_v42, %v203_v43  ;;  %v1807_v52 = vld [vmem:[%s2647_s1] ss:$8 sps:$4 sm:$0xff]   ;;  %v1808_v53 = vld [vmem:[%s2647_s1 + $0x84] ss:$8 sps:$4 sm:$0x3f]  }
  0x1c   :  { %v433_v44 = vsel %vm431_vm10, %v1616_v49, 0 }
  0x1d   :  { %447 = vmatpush1.bf16.msra.mxu0 %v1606_v31 }
  0x1e   :  { %148 = vrot.lane.b32.xlu0 %v134_v6, %s1890_s17  ;;  %211 = vrot.lane.b32.xlu1 %v198_v7, %s1891_s20 }
  0x1f   :  { %448 = vmatprep.subr.bf16.mxu0 %v1801_v32 }
  0x21   :  { %449 = vmatpush1.bf16.msra.mxu0 %v1604_v39 }
  0x22   :  { %209 = vrot.lane.b32.xlu0 %v195_v23, %s1891_s20  ;;  %93 = vrot.lane.b32.xlu1 %v82_v25, %s1889_s26 }
  0x23   :  { %450 = vmatprep.subr.bf16.mxu0 %v1803_v4 }
  0x25   :  { %451 = vmatpush1.bf16.msra.mxu0 %v1602_v46 }
  0x26   :  { %91 = vrot.lane.b32.xlu0 %v79_v35, %s1889_s26  ;;  %252 = vrot.lane.b32.xlu1 %v235_v29, %s1888_s13 }
  0x27   :  { %452 = vmatprep.subr.bf16.mxu0 %v1805_v47 }
  0x29   :  { %453 = vmatpush1.bf16.msra.mxu0 %v1807_v52 }
  0x2a   :  { %250 = vrot.lane.b32.xlu0 %v234_v38, %s1888_s13  ;;  %154 = vrot.lane.b32.xlu1 %v143_v45, %s1890_s17 }
  0x2b   :  { %1618 = vmatprep.subr.msk.bf16.mxu0 %vm431_vm10, %v1808_v53 }
  0x2d   :  { %469 = vmatpush2.bf16.msra.mxu0 %v433_v44 }
  0x2e   :  { %152 = vrot.lane.b32.xlu0 %v140_v50, %s1890_s17  ;;  %215 = vrot.lane.b32.xlu1 %v204_v51, %s1891_s20 }
  0x32   :  { %213 = vrot.lane.b32.xlu0 %v201_v16, %s1891_s20 }
  0x33   :  { %14 = vsyncpa [#allocation5], 0  ;;  %vm101_vm11 = vcmask 453856   ;;  %vm162_vm12 = vcmask 683456   ;;  %vm273_vm13 = vcmask 1044352   ;;  %vm274_vm14 = vcmask 97284  }
  0x34   :  { %vm223_vm15 = vcmask 913056   ;;  %vm2225_vm0 = vmor %vm274_vm14, %vm273_vm13  ;;  %vm260_vm1 = vcmask 916480   ;;  %vm421_vm2 = vcmask 97280   ;;  %s1892_s1 = smov 32   ;;  %vm516_vm3 = vcmask 261120   ;;  %s1894_s23 = smov 64  }
  0x35   :  { %vm529_vm4 = vcmask 778240   ;;  %vm537_vm5 = vcmask 779265   ;;  %vm599_vm7 = vcmask 781315   ;;  %vm576_vm8 = vcmask 780290   ;;  %s1898_s10 = smov [#allocation4]  }
  0x36   :  { %vm547_vm9 = vcmask 1041152   ;;  %vm548_vm10 = vcmask 520196   ;;  %vm606_vm13 = vcmask 1043202   ;;  %vm607_vm14 = vcmask 522246   ;;  %s1583_s11 = sshll.u32 %s1898_s10, 4  ;;  %s1584_s11 = int_to_ptr.vmem [resolvable:$true] %s1583_s11 }
  0x37   :  { %vm694_vm6 = vcmask 261127   ;;  %p1871_p1 = scmp.lt.s32.totalorder %s1584_s11, %s1584_s11 }
  0x74   :  { %v243_v54 = vpop.permute.xlu1 %242 }
  0x75   :  { %v254_v62 = vrot.slane %v243_v54, 4 }
  0x77   :  { %v261_v2 = vsel %vm260_vm1, %v254_v62, %v243_v54 }
  0x78   :  { %v84_v55 = vpop.permute.xlu0 %83  ;;  %v245_v56 = vpop.permute.xlu1 %244 }
  0x79   :  { %102 = vst.msk [vmem:[#allocation2] sm:$0xf] %vm101_vm11, %v84_v55  ;;  %v255_v24 = vrot.slane %v245_v56, 4 }
  0x7b   :  { %v262_v63 = vsel %vm260_vm1, %v255_v24, %v245_v56 }
  0x7c   :  { %v86_v57 = vpop.permute.xlu0 %85  ;;  %v147_v58 = vpop.permute.xlu1 %146 }
  0x7d   :  { %103 = vst.msk [vmem:[#allocation2 + $0x8] sm:$0xf] %vm101_vm11, %v86_v57 }
  0x7e   :  { %164 = vst.msk [vmem:[#allocation2 + $0x8] sm:$0xf] %vm162_vm12, %v147_v58 }
  0x80   :  { %v145_v60 = vpop.permute.xlu0 %144  ;;  %v208_v61 = vpop.permute.xlu1 %207 }
  0x81   :  { %163 = vst.msk [vmem:[#allocation2] sm:$0xf] %vm162_vm12, %v145_v60 }
  0x82   :  { %225 = vst.msk [vmem:[#allocation2 + $0x8] sm:$0xf] %vm223_vm15, %v208_v61 }
  0x83   :  { %277 = vst.msk [vmem:[#allocation2 + $0x8] sm:$0xff] %vm2225_vm0, %v262_v63 }
  0x84   :  { %v206_v0 = vpop.permute.xlu0 %205  ;;  %v90_v1 = vpop.permute.xlu1 %89 }
  0x85   :  { %224 = vst.msk [vmem:[#allocation2] sm:$0xf] %vm223_vm15, %v206_v0 }
  0x86   :  { %105 = vst.msk [vmem:[#allocation2 + $0x18] sm:$0xf] %vm101_vm11, %v90_v1 }
  0x87   :  { %276 = vst.msk [vmem:[#allocation2] sm:$0xff] %vm2225_vm0, %v261_v2 }
  0x88   :  { %v88_v3 = vpop.permute.xlu0 %87  ;;  %v249_v5 = vpop.permute.xlu1 %248 }
  0x89   :  { %104 = vst.msk [vmem:[#allocation2 + $0x10] sm:$0xf] %vm101_vm11, %v88_v3  ;;  %v257_v8 = vrot.slane %v249_v5, 4 }
  0x8b   :  { %v264_v13 = vsel %vm260_vm1, %v257_v8, %v249_v5 }
  0x8c   :  { %v247_v6 = vpop.permute.xlu0 %246  ;;  %v151_v7 = vpop.permute.xlu1 %150 }
  0x8d   :  { %166 = vst.msk [vmem:[#allocation2 + $0x18] sm:$0xf] %vm162_vm12, %v151_v7  ;;  %v256_v14 = vrot.slane %v247_v6, 4 }
  0x8e   :  { %v1810_v9 = vld [vmem:[#allocation2] ss:$8 sps:$4 sm:$0xff]   ;;  %v1812_v10 = vld [vmem:[#allocation2 + $0x4] ss:$8 sps:$4 sm:$0xff]  }
  0x8f   :  { %1619 = vmatprep.mubr.msk.bf16.mxu0 %vm421_vm2, %v1812_v10  ;;  %v263_v18 = vsel %vm260_vm1, %v256_v14, %v247_v6 }
  0x90   :  { %v149_v11 = vpop.permute.xlu0 %148  ;;  %v212_v12 = vpop.permute.xlu1 %211  ;;  %471 = vmatmul.mubr.bf16.vlgmr.msra.gmra.mxu0 %v1810_v9  ;;  %v2292_v9 = vld [vmem:[%s2648_s2] ss:$0 sm:$0xff]  ;;  %s1893_s2 = smov 96  }
  0x91   :  { %165 = vst.msk [vmem:[#allocation2 + $0x10] sm:$0xf] %vm162_vm12, %v149_v11 }
  0x92   :  { %227 = vst.msk [vmem:[#allocation2 + $0x18] sm:$0xf] %vm223_vm15, %v212_v12 }
  0x93   :  { %279 = vst.msk [vmem:[#allocation2 + $0x18] sm:$0xff] %vm2225_vm0, %v264_v13 }
  0x94   :  { %v210_v15 = vpop.permute.xlu0 %209  ;;  %v94_v17 = vpop.permute.xlu1 %93 }
  0x95   :  { %226 = vst.msk [vmem:[#allocation2 + $0x10] sm:$0xf] %vm223_vm15, %v210_v15 }
  0x96   :  { %107 = vst.msk [vmem:[#allocation2 + $0x28] sm:$0xf] %vm101_vm11, %v94_v17 }
  0x97   :  { %278 = vst.msk [vmem:[#allocation2 + $0x10] sm:$0xff] %vm2225_vm0, %v263_v18 }
  0x98   :  { %v92_v19 = vpop.permute.xlu0 %91  ;;  %v253_v20 = vpop.permute.xlu1 %252 }
  0x99   :  { %106 = vst.msk [vmem:[#allocation2 + $0x20] sm:$0xf] %vm101_vm11, %v92_v19  ;;  %v259_v23 = vrot.slane %v253_v20, 4  ;;  %vm544_vm11 = vcmask 785408  }
  0x9a   :  { %v285_v26 = vld [vmem:[#allocation2 + $0x18] sm:$0xff] }
  0x9b   :  { %v266_v31 = vsel %vm260_vm1, %v259_v23, %v253_v20 }
  0x9c   :  { %v251_v21 = vpop.permute.xlu0 %250  ;;  %v155_v22 = vpop.permute.xlu1 %154 }
  0x9d   :  { %168 = vst.msk [vmem:[#allocation2 + $0x28] sm:$0xf] %vm162_vm12, %v155_v22  ;;  %v258_v32 = vrot.slane %v251_v21, 4 }
  0x9e   :  { %v284_v25 = vld [vmem:[#allocation2 + $0x10] sm:$0xff] }
  0x9f   :  { %v1813_v27 = vld [vmem:[#allocation2 + $0x14] ss:$8 sps:$4 sm:$0xff]   ;;  %v1596_v28 = vcombine.low %v284_v25, %v285_v26  ;;  %v265_v34 = vsel %vm260_vm1, %v258_v32, %v251_v21  ;;  %vm2432_vm1 = vmor %vm607_vm14, %vm606_vm13  ;;  %vm657_vm14 = vcmask 1044227  }
  0xa0   :  { %1620 = vmatprep.mubr.msk.bf16.mxu0 %vm421_vm2, %v1813_v27  ;;  %v153_v29 = vpop.permute.xlu0 %152  ;;  %v216_v30 = vpop.permute.xlu1 %215  ;;  %v1818_v26 = vld [vmem:[%s2649_s3 + $0x78] sm:$0xff]  }
  0xa1   :  { %481 = vmatmul.mubr.bf16.gmra.mxu0 %v1596_v28  ;;  %167 = vst.msk [vmem:[#allocation2 + $0x20] sm:$0xf] %vm162_vm12, %v153_v29  ;;  %1693 = vmatprep.subr.bf16.mxu1 %v1818_v26  ;;  %v1895_v26 = vmov 0   ;;  %vm2425_vm12 = vmor %vm548_vm10, %vm547_vm9  ;;  %vm591_vm9 = vcmask 523264  }
  0xa2   :  { %229 = vst.msk [vmem:[#allocation2 + $0x28] sm:$0xf] %vm223_vm15, %v216_v30  ;;  %v1819_v30 = vld [vmem:[%s2649_s3 + $0x38] sm:$0xff]  }
  0xa3   :  { %281 = vst.msk [vmem:[#allocation2 + $0x28] sm:$0xff] %vm2225_vm0, %v266_v31  ;;  %1694 = vmatpush3.bf16.msra.mxu1 %v1819_v30 }
  0xa4   :  { %v214_v33 = vpop.permute.xlu0 %213 }
  0xa5   :  { %228 = vst.msk [vmem:[#allocation2 + $0x20] sm:$0xf] %vm223_vm15, %v214_v33  ;;  %v1820_v33 = vld [vmem:[%s2649_s3 + $0x70] sm:$0xff]   ;;  %vm584_vm15 = vcmask 1042177  }
  0xa6   :  { %280 = vst.msk [vmem:[#allocation2 + $0x20] sm:$0xff] %vm2225_vm0, %v265_v34  ;;  %1695 = vmatprep.subr.bf16.mxu1 %v1820_v33  ;;  %vm585_vm0 = vcmask 521221  }
  0xad   :  { %v1815_v35 = vld [vmem:[#allocation2 + $0x24] ss:$8 sps:$4 sm:$0xff]   ;;  %v1817_v36 = vld [vmem:[#allocation2 + $0x20] ss:$8 sps:$4 sm:$0xff]  }
  0xae   :  { %1621 = vmatprep.mubr.msk.bf16.mxu0 %vm421_vm2, %v1815_v35  ;;  %vm2436_vm2 = vmor %vm585_vm0, %vm584_vm15  ;;  %vm658_vm15 = vcmask 523271   ;;  %vm667_vm0 = vcmask 1042946  }
  0xaf   :  { %491 = vmatmul.mubr.bf16.gmra.mxu0 %v1817_v36  ;;  %v1821_v36 = vld [vmem:[%s2649_s3 + $0x30] sm:$0xff]  }
  0xb0   :  { %1696 = vmatpush3.bf16.msra.mxu1 %v1821_v36  ;;  %v1843_v36 = vld [vmem:[%s2649_s3 + $0x98] sm:$0xff]  }
 0x150   :  { %v472_v37 = vpop.f32.mrf.mxu0 }
 0x151   :  { %v504_v38 = vrot.slane %v472_v37, 2 }
 0x152   :  { %v474_v39 = vpop.f32.mrf.mxu0 }
 0x153   :  { %v508_v4 = vmax.f32 %v472_v37, %v504_v38  ;;  %v505_v40 = vrot.slane %v474_v39, 2 }
 0x154   :  { %v476_v41 = vpop.f32.mrf.mxu0 }
 0x155   :  { %v509_v42 = vmax.f32 %v474_v39, %v505_v40  ;;  %v553_v43 = vrot.slane %v476_v41, 2  ;;  %512 = vrot.lane.b32.xlu0 %v508_v4, %s1892_s1  ;;  %v1822_v40 = vld [vmem:[%s2649_s3 + $0x68] sm:$0xff]  }
 0x156   :  { %v478_v45 = vpop.f32.mrf.mxu0  ;;  %1697 = vmatprep.subr.bf16.mxu1 %v1822_v40 }
 0x157   :  { %v557_v46 = vmax.f32 %v476_v41, %v553_v43  ;;  %v554_v47 = vrot.slane %v478_v45, 2  ;;  %514 = vrot.lane.b32.xlu1 %v509_v42, %s1892_s1  ;;  %v1823_v43 = vld [vmem:[%s2649_s3 + $0x28] sm:$0xff]  }
 0x158   :  { %1698 = vmatpush3.bf16.msra.mxu1 %v1823_v43 }
 0x159   :  { %v558_v48 = vmax.f32 %v478_v45, %v554_v47  ;;  %561 = vrot.lane.b32.xlu0 %v557_v46, %s1892_s1  ;;  %v1824_v47 = vld [vmem:[%s2649_s3 + $0x60] sm:$0xff]  }
 0x15a   :  { %1699 = vmatprep.subr.bf16.mxu1 %v1824_v47 }
 0x15b   :  { %563 = vrot.lane.b32.xlu1 %v558_v48, %s1892_s1 }
 0x161   :  { %v482_v49 = vpop.f32.mrf.mxu0 }
 0x162   :  { %v629_v50 = vrot.slane %v482_v49, 2 }
 0x163   :  { %v484_v51 = vpop.f32.mrf.mxu0 }
 0x164   :  { %v2269_v52 = vmax.f32 %v482_v49, %v629_v50  ;;  %v630_v53 = vrot.slane %v484_v51, 2 }
 0x165   :  { %v486_v44 = vpop.f32.mrf.mxu0 }
 0x166   :  { %v634_v16 = vmax.f32 %v484_v51, %v630_v53  ;;  %v705_v54 = vrot.slane %v486_v44, 2  ;;  %637 = vrot.lane.b32.xlu0 %v2269_v52, %s1892_s1  ;;  %v1825_v51 = vld [vmem:[%s2649_s3 + $0x20] sm:$0xff]  }
 0x167   :  { %v488_v55 = vpop.f32.mrf.mxu0  ;;  %1700 = vmatpush3.bf16.msra.mxu1 %v1825_v51 }
 0x168   :  { %v2273_v56 = vmax.f32 %v486_v44, %v705_v54  ;;  %v706_v57 = vrot.slane %v488_v55, 2  ;;  %639 = vrot.lane.b32.xlu1 %v634_v16, %s1892_s1  ;;  %v1826_v44 = vld [vmem:[%s2649_s3 + $0x58] sm:$0xff]  }
 0x169   :  { %1701 = vmatprep.subr.bf16.mxu1 %v1826_v44 }
 0x16a   :  { %v710_v58 = vmax.f32 %v488_v55, %v706_v57  ;;  %713 = vrot.lane.b32.xlu0 %v2273_v56, %s1892_s1 }
 0x16c   :  { %715 = vrot.lane.b32.xlu1 %v710_v58, %s1892_s1  ;;  %v1827_v58 = vld [vmem:[%s2649_s3 + $0x18] sm:$0xff]  }
 0x16d   :  { %1702 = vmatpush3.bf16.msra.mxu1 %v1827_v58 }
 0x16f   :  { %v492_v24 = vpop.f32.mrf.mxu0 }
 0x170   :  { %v772_v59 = vrot.slane %v492_v24, 2 }
 0x171   :  { %v494_v60 = vpop.f32.mrf.mxu0 }
 0x172   :  { %v2279_v61 = vmax.f32 %v492_v24, %v772_v59  ;;  %v773_v62 = vrot.slane %v494_v60, 2 }
 0x173   :  { %v496_v63 = vpop.f32.mrf.mxu0 }
 0x174   :  { %v777_v0 = vmax.f32 %v494_v60, %v773_v62  ;;  %v828_v1 = vrot.slane %v496_v63, 2  ;;  %780 = vrot.lane.b32.xlu0 %v2279_v61, %s1892_s1  ;;  %v1828_v60 = vld [vmem:[%s2649_s3 + $0x50] sm:$0xff]  }
 0x175   :  { %v498_v2 = vpop.f32.mrf.mxu0  ;;  %1703 = vmatprep.subr.bf16.mxu1 %v1828_v60 }
 0x176   :  { %v2283_v3 = vmax.f32 %v496_v63, %v828_v1  ;;  %v829_v5 = vrot.slane %v498_v2, 2  ;;  %782 = vrot.lane.b32.xlu1 %v777_v0, %s1892_s1  ;;  %v1829_v0 = vld [vmem:[%s2649_s3 + $0x10] sm:$0xff]  }
 0x177   :  { %1704 = vmatpush3.bf16.msra.mxu1 %v1829_v0 }
 0x178   :  { %v833_v6 = vmax.f32 %v498_v2, %v829_v5  ;;  %836 = vrot.lane.b32.xlu0 %v2283_v3, %s1892_s1 }
 0x17a   :  { %838 = vrot.lane.b32.xlu1 %v833_v6, %s1892_s1 }
 0x1c7   :  { %v513_v7 = vpop.permute.xlu0 %512 }
 0x1c9   :  { %v515_v8 = vpop.permute.xlu1 %514 }
 0x1ca   :  { %v517_v10 = vsel %vm516_vm3, %v513_v7, %v515_v8 }
 0x1cb   :  { %v519_v11 = vmax.f32 %v508_v4, %v517_v10  ;;  %v562_v13 = vpop.permute.xlu0 %561 }
 0x1cd   :  { %v526_v12 = vadd.f32 %v2292_v9, %v519_v11  ;;  %v564_v14 = vpop.permute.xlu1 %563  ;;  %v1831_v11 = vld [vmem:[%s2649_s3 + $0x8] sm:$0xff]  }
 0x1ce   :  { %v565_v15 = vsel %vm516_vm3, %v562_v13, %v564_v14  ;;  %v1832_v14 = vld [vmem:[%s2649_s3 + $0x40] sm:$0xff]  }
 0x1cf   :  { %v527_v17 = vmax.f32 %v526_v12, 0.0  ;;  %v567_v18 = vmax.f32 %v557_v46, %v565_v15 }
 0x1d1   :  { %v528_v19 = vpack.c.bf16 %v527_v17, %v527_v17  ;;  %v568_v20 = vadd.f32 %v2292_v9, %v567_v18  ;;  %v1833_v18 = vld [vmem:[%s2649_s3] sm:$0xff]  }
 0x1d3   :  { %v569_v21 = vmax.f32 %v568_v20, 0.0  ;;  %v1625_v22 = vrot.slane %v528_v19, 10  ;;  %530 = vst.msk [vmem:[#allocation3] sm:$0x1] %vm529_vm4, %v528_v19  ;;  %v1624_v23 = vrot.slane %v528_v19, 9 }
 0x1d5   :  { %v2299_v25 = vpack.c.bf16 %v569_v21, %v569_v21  ;;  %541 = vrot.lane.b32.xlu0 %v1625_v22, %s1893_s2  ;;  %538 = vst.msk [vmem:[#allocation3] sm:$0x2] %vm537_vm5, %v1624_v23 }
 0x1d7   :  { %v578_v28 = vrot.slane %v2299_v25, 7  ;;  %v574_v29 = vrot.slane %v2299_v25, 6  ;;  %v1627_v35 = vrot.slane %v2299_v25, 9 }
 0x1d8   :  { %v638_v27 = vpop.permute.xlu0 %637 }
 0x1d9   :  { %601 = vrot.lane.b32.xlu0 %v2299_v25, %s1893_s2  ;;  %600 = vst.msk [vmem:[#allocation3] sm:$0x8] %vm599_vm7, %v578_v28  ;;  %579 = vrot.lane.b32.xlu1 %v578_v28, %s1893_s2  ;;  %v621_v20 = vrot.slane %v574_v29, 4 }
 0x1da   :  { %v640_v31 = vpop.permute.xlu1 %639  ;;  %577 = vst.msk [vmem:[#allocation3] sm:$0x4] %vm576_vm8, %v574_v29 }
 0x1db   :  { %v641_v32 = vsel %vm516_vm3, %v638_v27, %v640_v31 }
 0x1dc   :  { %v643_v34 = vmax.f32 %v2269_v52, %v641_v32  ;;  %v714_v38 = vpop.permute.xlu0 %713 }
 0x1dd   :  { %588 = vrot.lane.b32.xlu0 %v2299_v25, %s1894_s23  ;;  %612 = vrot.lane.b32.xlu1 %v1627_v35, %s1894_s23 }
 0x1de   :  { %v644_v37 = vadd.f32 %v2292_v9, %v643_v34  ;;  %v716_v39 = vpop.permute.xlu1 %715 }
 0x1df   :  { %v717_v4 = vsel %vm516_vm3, %v714_v38, %v716_v39 }
 0x1e0   :  { %v645_v41 = vmax.f32 %v644_v37, 0.0  ;;  %v719_v42 = vmax.f32 %v2273_v56, %v717_v4 }
 0x1e2   :  { %v2339_v45 = vpack.c.bf16 %v645_v41, %v645_v41  ;;  %v720_v46 = vadd.f32 %v2292_v9, %v719_v42  ;;  %v1849_v41 = vld [vmem:[%s2649_s3 + $0xd8] sm:$0xff]  }
 0x1e4   :  { %v721_v48 = vmax.f32 %v720_v46, 0.0  ;;  %v661_v49 = vrot.slane %v2339_v45, 6  ;;  %v651_v50 = vrot.slane %v2339_v45, 5  ;;  %677 = vst.msk [vmem:[#allocation3 + $0xc] sm:$0x1] %vm529_vm4, %v2339_v45  ;;  %v671_v55 = vrot.slane %v2339_v45, 7 }
 0x1e5   :  { %647 = vst.msk [vmem:[#allocation3 + $0x10] sm:$0x1] %vm529_vm4, %v2339_v45 }
 0x1e6   :  { %v2354_v52 = vpack.c.bf16 %v721_v48, %v721_v48  ;;  %662 = vrot.lane.b32.xlu0 %v661_v49, %s1894_s23  ;;  %v678_v53 = vrot.slane %v651_v50, 4  ;;  %652 = vrot.lane.b32.xlu1 %v651_v50, %s1893_s2  ;;  %v781_v16 = vpop.permute.xlu0 %780  ;;  %v681_v54 = vrot.slane %v661_v49, 4  ;;  %v1855_v49 = vld [vmem:[%s2651_s5] sm:$0xff]  }
 0x1e8   :  { %702 = vst.msk [vmem:[#allocation3 + $0xc] sm:$0x2] %vm537_vm5, %v678_v53  ;;  %680 = vst.msk [vmem:[#allocation3 + $0x10] sm:$0x2] %vm537_vm5, %v678_v53  ;;  %v729_v56 = vrot.slane %v2354_v52, 7  ;;  %v726_v57 = vrot.slane %v2354_v52, 6  ;;  %v783_v24 = vpop.permute.xlu1 %782 }
 0x1e9   :  { %v784_v59 = vsel %vm516_vm3, %v781_v16, %v783_v24  ;;  %v742_v63 = vrot.slane %v2354_v52, 5 }
 0x1ea   :  { %682 = vrot.lane.b32.xlu0 %v681_v54, %s1893_s2  ;;  %688 = vrot.lane.b32.xlu1 %v671_v55, %s1894_s23  ;;  %769 = vst.msk [vmem:[#allocation3 + $0xc] sm:$0x8] %vm599_vm7, %v729_v56  ;;  %750 = vst.msk [vmem:[#allocation3 + $0x10] sm:$0x8] %vm599_vm7, %v729_v56  ;;  %v786_v62 = vmax.f32 %v2279_v61, %v784_v59  ;;  %v837_v2 = vpop.permute.xlu0 %836  ;;  %v1830_v61 = vld [vmem:[%s2649_s3 + $0x48] sm:$0xff]   ;;  %v764_v25 = vrot.slane %v726_v57, 4 }
 0x1eb   :  { %748 = vst.msk [vmem:[#allocation3 + $0xc] sm:$0x4] %vm576_vm8, %v726_v57  ;;  %728 = vst.msk [vmem:[#allocation3 + $0x10] sm:$0x4] %vm576_vm8, %v726_v57  ;;  %v757_v10 = vrot.slane %v742_v63, 4  ;;  %1705 = vmatprep.subr.bf16.mxu1 %v1830_v61 }
 0x1ec   :  { %v787_v1 = vadd.f32 %v2292_v9, %v786_v62  ;;  %v839_v5 = vpop.permute.xlu1 %838  ;;  %1706 = vmatpush3.bf16.msra.mxu1 %v1831_v11 }
 0x1ed   :  { %v840_v6 = vsel %vm516_vm3, %v837_v2, %v839_v5  ;;  %1707 = vmatprep.subr.bf16.mxu1 %v1832_v14 }
 0x1ee   :  { %751 = vrot.lane.b32.xlu0 %v2354_v52, %s1893_s2  ;;  %730 = vrot.lane.b32.xlu1 %v729_v56, %s1893_s2  ;;  %v788_v7 = vmax.f32 %v787_v1, 0.0  ;;  %v842_v8 = vmax.f32 %v2283_v3, %v840_v6 }
 0x1f0   :  { %v789_v12 = vpack.c.bf16 %v788_v7, %v788_v7  ;;  %v843_v13 = vadd.f32 %v2292_v9, %v842_v8  ;;  %1708 = vmatpush3.bf16.msra.mxu1 %v1833_v18 }
 0x1f1   :  { %1168 = vmatprep.subr.bf16.mxu1 %v1895_v26 }
 0x1f2   :  { %736 = vrot.lane.b32.xlu0 %v2354_v52, %s1894_s23  ;;  %758 = vrot.lane.b32.xlu1 %v757_v10, %s1894_s23  ;;  %v844_v3 = vmax.f32 %v843_v13, 0.0  ;;  %v800_v15 = vrot.slane %v789_v12, 6  ;;  %v793_v17 = vrot.slane %v789_v12, 5  ;;  %812 = vst.msk [vmem:[#allocation3 + $0x1c] sm:$0x1] %vm529_vm4, %v789_v12  ;;  %v807_v23 = vrot.slane %v789_v12, 7 }
 0x1f3   :  { %vm594_vm4 = vcmask 1040896  }
 0x1f4   :  { %v1692_v9 = vpack.c.bf16 %v844_v3, %v844_v3  ;;  %v823_v19 = vrot.slane %v793_v17, 4 }
 0x1f6   :  { %801 = vrot.lane.b32.xlu0 %v800_v15, %s1894_s23  ;;  %794 = vrot.lane.b32.xlu1 %v793_v17, %s1893_s2  ;;  %v854_v21 = vrot.slane %v1692_v9, 6  ;;  %v857_v22 = vrot.slane %v1692_v9, 7  ;;  %825 = vst.msk [vmem:[#allocation3 + $0x1c] sm:$0x2] %vm537_vm5, %v823_v19  ;;  %v849_v27 = vrot.slane %v1692_v9, 5  ;;  %vm595_vm5 = vcmask 258052  }
 0x1f7   :  { %vm2446_vm10 = vmor %vm595_vm5, %vm594_vm4  ;;  %vm668_vm4 = vcmask 260102  }
 0x1f8   :  { %859 = vst.msk [vmem:[#allocation3 + $0x1c] sm:$0x8] %vm599_vm7, %v857_v22  ;;  %vm617_vm7 = vcmask 1041921   ;;  %vm2460_vm5 = vmor %vm658_vm15, %vm657_vm14 }
 0x1f9   :  { %856 = vst.msk [vmem:[#allocation3 + $0x1c] sm:$0x4] %vm576_vm8, %v854_v21  ;;  %vm618_vm8 = vcmask 259077  }
 0x1fa   :  { %622 = vrot.lane.b32.xlu0 %v621_v20, %s1892_s1  ;;  %813 = vrot.lane.b32.xlu1 %v807_v23, %s1894_s23  ;;  %vm2450_vm13 = vmor %vm618_vm8, %vm617_vm7  ;;  %vm693_vm8 = vcmask 1043971  }
 0x1fb   :  { %vm2464_vm7 = vmor %vm668_vm4, %vm667_vm0 }
 0x1fc   :  { %vm2474_vm14 = vmor %vm694_vm6, %vm693_vm8  ;;  %vm625_vm6 = vcmask 1040640  }
 0x1fe   :  { %697 = vrot.lane.b32.xlu0 %v2339_v45, %s1892_s1  ;;  %672 = vrot.lane.b32.xlu1 %v671_v55, %s1892_s1  ;;  %v1852_v45 = vld [vmem:[%s2649_s3 + $0xc0] sm:$0xff]  }
 0x202   :  { %765 = vrot.lane.b32.xlu0 %v764_v25, %s1892_s1  ;;  %743 = vrot.lane.b32.xlu1 %v742_v63, %s1892_s1  ;;  %v1837_v25 = vld [vmem:[%s2649_s3 + $0xb8] sm:$0xff]  }
 0x206   :  { %819 = vrot.lane.b32.xlu0 %v789_v12, %s1892_s1  ;;  %808 = vrot.lane.b32.xlu1 %v807_v23, %s1892_s1 }
 0x20a   :  { %850 = vrot.lane.b32.xlu1 %v849_v27, %s1892_s1 }
 0x247   :  { %v542_v28 = vpop.permute.xlu0 %541 }
 0x248   :  { %v543_v30 = vrot.slane %v542_v28, 4 }
 0x24a   :  { %v545_v31 = vsel %vm544_vm11, %v543_v30, %v542_v28 }
 0x24b   :  { %550 = vst.msk [vmem:[#allocation3] sm:$0x11] %vm2425_vm12, %v545_v31  ;;  %v602_v33 = vpop.permute.xlu0 %601  ;;  %v580_v34 = vpop.permute.xlu1 %579  ;;  %v1838_v31 = vld [vmem:[%s2649_s3 + $0xb0] sm:$0xff]  }
 0x24c   :  { %v603_v35 = vrot.slane %v602_v33, 4  ;;  %v581_v37 = vrot.slane %v580_v34, 4 }
 0x24e   :  { %v604_v38 = vsel %vm544_vm11, %v603_v35, %v602_v33  ;;  %v582_v39 = vsel %vm544_vm11, %v581_v37, %v580_v34  ;;  %v1839_v33 = vld [vmem:[%s2649_s3 + $0xa8] sm:$0xff]   ;;  %v1840_v34 = vld [vmem:[%s2649_s3 + $0xa0] sm:$0xff]   ;;  %v1844_v37 = vld [vmem:[%s2649_s3 + $0x90] sm:$0xff]  }
 0x24f   :  { %609 = vst.msk [vmem:[#allocation3] sm:$0x44] %vm2432_vm1, %v604_v38  ;;  %v589_v4 = vpop.permute.xlu0 %588  ;;  %v613_v40 = vpop.permute.xlu1 %612  ;;  %v1841_v35 = vld [vmem:[#allocation3 + $0xc] ss:$16 sps:$4 sm:$0xff]  }
 0x250   :  { %587 = vst.msk [vmem:[#allocation3] sm:$0x22] %vm2436_vm2, %v582_v39  ;;  %v590_v42 = vrot.slane %v589_v4, 4  ;;  %v614_v43 = vrot.slane %v613_v40, 4  ;;  %v1845_v38 = vld [vmem:[%s2649_s3 + $0x88] sm:$0xff]   ;;  %v1846_v39 = vld [vmem:[%s2649_s3 + $0x80] sm:$0xff]  }
 0x252   :  { %v592_v46 = vsel %vm591_vm9, %v590_v42, %v589_v4  ;;  %v615_v47 = vsel %vm591_vm9, %v614_v43, %v613_v40  ;;  %v1847_v4 = vld [vmem:[%s2649_s3 + $0xe8] sm:$0xff]   ;;  %v1848_v40 = vld [vmem:[%s2649_s3 + $0xe0] sm:$0xff]   ;;  %v1850_v42 = vld [vmem:[%s2649_s3 + $0xd0] sm:$0xff]  }
 0x253   :  { %597 = vst.msk [vmem:[#allocation3 + $0x4] sm:$0x11] %vm2446_vm10, %v592_v46  ;;  %v1851_v43 = vld [vmem:[%s2649_s3 + $0xc8] sm:$0xff]  }
 0x254   :  { %620 = vst.msk [vmem:[#allocation3 + $0x4] sm:$0x22] %vm2450_vm13, %v615_v47  ;;  %v1854_v47 = vld [vmem:[%s2651_s5 + $0x8] sm:$0xff]  }
 0x258   :  { %v663_v48 = vpop.permute.xlu0 %662  ;;  %v653_v50 = vpop.permute.xlu1 %652 }
 0x259   :  { %v664_v51 = vrot.slane %v663_v48, 4  ;;  %v654_v52 = vrot.slane %v653_v50, 4 }
 0x25b   :  { %v665_v44 = vsel %vm591_vm9, %v664_v51, %v663_v48  ;;  %v655_v16 = vsel %vm544_vm11, %v654_v52, %v653_v50  ;;  %v1896_v48 = vmov 0.0   ;;  %v1856_v52 = vld [vmem:[%s2651_s5 + $0x18] sm:$0xff]  }
 0x25c   :  { %660 = vst.msk [vmem:[#allocation3] sm:$0x88] %vm2460_vm5, %v655_v16  ;;  %v683_v54 = vpop.permute.xlu0 %682  ;;  %v689_v55 = vpop.permute.xlu1 %688  ;;  %1740 = vmatprep.subr.bf16.mxu0 %v1896_v48  ;;  %v1857_v16 = vld [vmem:[%s2651_s5 + $0x10] sm:$0xff]  }
 0x25d   :  { %670 = vst.msk [vmem:[#allocation3 + $0x4] sm:$0x44] %vm2464_vm7, %v665_v44  ;;  %v684_v56 = vrot.slane %v683_v54, 4  ;;  %v690_v57 = vrot.slane %v689_v55, 4  ;;  %1741 = vmatpush3.bf16.msra.mxu0 %v1854_v47 }
 0x25e   :  { %1742 = vmatprep.subr.bf16.mxu0 %v1896_v48 }
 0x25f   :  { %v685_v24 = vsel %vm544_vm11, %v684_v56, %v683_v54  ;;  %v691_v59 = vsel %vm591_vm9, %v690_v57, %v689_v55 }
 0x260   :  { %687 = vst.msk [vmem:[#allocation3 + $0x10] sm:$0x11] %vm2425_vm12, %v685_v24  ;;  %v752_v60 = vpop.permute.xlu0 %751  ;;  %v731_v62 = vpop.permute.xlu1 %730  ;;  %vm700_vm12 = vcmask 1042690  }
 0x261   :  { %696 = vst.msk [vmem:[#allocation3 + $0x4] sm:$0x88] %vm2474_vm14, %v691_v59  ;;  %v753_v63 = vrot.slane %v752_v60, 4  ;;  %v732_v0 = vrot.slane %v731_v62, 4  ;;  %1743 = vmatpush3.bf16.msra.mxu0 %v1855_v49  ;;  %v1681_v49 = vld [vmem:[%s2654_s8] ss:$0 sm:$0xff] }
 0x262   :  { %1748 = vmatprep.subr.bf16.mxu0 %v1896_v48 }
 0x263   :  { %v754_v1 = vsel %vm544_vm11, %v753_v63, %v752_v60  ;;  %v733_v2 = vsel %vm544_vm11, %v732_v0, %v731_v62 }
 0x264   :  { %756 = vst.msk [vmem:[#allocation3 + $0x10] sm:$0x44] %vm2432_vm1, %v754_v1  ;;  %v737_v5 = vpop.permute.xlu0 %736  ;;  %v759_v6 = vpop.permute.xlu1 %758  ;;  %vm675_vm1 = vcmask 1041665   ;;  %v1667_v1 = vld [vmem:[%s2650_s4] ss:$0 sm:$0xff] }
 0x265   :  { %735 = vst.msk [vmem:[#allocation3 + $0x10] sm:$0x22] %vm2436_vm2, %v733_v2  ;;  %v738_v61 = vrot.slane %v737_v5, 4  ;;  %v760_v7 = vrot.slane %v759_v6, 4  ;;  %vm746_vm2 = vcmask 1043715  }
 0x267   :  { %v739_v8 = vsel %vm591_vm9, %v738_v61, %v737_v5  ;;  %v761_v10 = vsel %vm591_vm9, %v760_v7, %v759_v6 }
 0x268   :  { %v802_v11 = vpop.permute.xlu0 %801  ;;  %v795_v12 = vpop.permute.xlu1 %794  ;;  %741 = vst.msk [vmem:[#allocation3 + $0x14] sm:$0x11] %vm2446_vm10, %v739_v8  ;;  %vm1575_vm10 = vcmask 74752  }
 0x269   :  { %763 = vst.msk [vmem:[#allocation3 + $0x14] sm:$0x22] %vm2450_vm13, %v761_v10  ;;  %v803_v13 = vrot.slane %v802_v11, 4  ;;  %v796_v14 = vrot.slane %v795_v12, 4  ;;  %v1858_v10 = vld [vmem:[%s2651_s5 + $0x28] sm:$0xff]  }
 0x26b   :  { %v804_v3 = vsel %vm591_vm9, %v803_v13, %v802_v11  ;;  %v797_v15 = vsel %vm544_vm11, %v796_v14, %v795_v12  ;;  %v1859_v14 = vld [vmem:[%s2651_s5 + $0x20] sm:$0xff]  }
 0x26c   :  { %799 = vst.msk [vmem:[#allocation3 + $0x10] sm:$0x88] %vm2460_vm5, %v797_v15  ;;  %v623_v17 = vpop.permute.xlu0 %622  ;;  %v814_v18 = vpop.permute.xlu1 %813  ;;  %v1860_v15 = vld [vmem:[%s2651_s5 + $0x38] sm:$0xff]  }
 0x26d   :  { %806 = vst.msk [vmem:[#allocation3 + $0x14] sm:$0x44] %vm2464_vm7, %v804_v3  ;;  %v815_v9 = vrot.slane %v814_v18, 4 }
 0x26e   :  { %626 = vst.msk [vmem:[#allocation3 + $0x8] sm:$0x1] %vm625_vm6, %v623_v17 }
 0x26f   :  { %v816_v19 = vsel %vm591_vm9, %v815_v9, %v814_v18  ;;  %v1861_v18 = vld [vmem:[%s2651_s5 + $0x30] sm:$0xff]   ;;  %vm2681_vm9 = vcmask 1040384  }
 0x270   :  { %818 = vst.msk [vmem:[#allocation3 + $0x14] sm:$0x88] %vm2474_vm14, %v816_v19  ;;  %v698_v20 = vpop.permute.xlu0 %697  ;;  %v673_v21 = vpop.permute.xlu1 %672  ;;  %v1862_v19 = vld [vmem:[%s2653_s7 + $0x18] ss:$0 sps:$4 sm:$0x11]  }
 0x271   :  { %701 = vst.msk [vmem:[#allocation3 + $0x8] sm:$0x4] %vm700_vm12, %v698_v20  ;;  %v1533_v20 = vsel %vm2681_vm9, %v1862_v19, 0 }
 0x272   :  { %676 = vst.msk [vmem:[#allocation3 + $0x8] sm:$0x2] %vm675_vm1, %v673_v21  ;;  %v1863_v21 = vld [vmem:[%s2653_s7 + $0x10] sm:$0xff]  }
 0x273   :  { %v1834_v27 = vld [vmem:[#allocation3] ss:$16 sps:$4 sm:$0xff]  }
 0x274   :  { %v766_v22 = vpop.permute.xlu0 %765  ;;  %v744_v23 = vpop.permute.xlu1 %743 }
 0x275   :  { %768 = vst.msk [vmem:[#allocation3 + $0x18] sm:$0x1] %vm625_vm6, %v766_v22  ;;  %v1864_v22 = vld [vmem:[%s2653_s7 + $0x8] sm:$0xff]  }
 0x276   :  { %747 = vst.msk [vmem:[#allocation3 + $0x8] sm:$0x8] %vm746_vm2, %v744_v23  ;;  %v1865_v23 = vld [vmem:[%s2653_s7] sm:$0xff]  }
 0x277   :  { %v1836_v28 = vld [vmem:[#allocation3 + $0x4] ss:$16 sps:$4 sm:$0xff]  }
 0x278   :  { %v820_v29 = vpop.permute.xlu0 %819  ;;  %v809_v30 = vpop.permute.xlu1 %808  ;;  %1159 = vmatprep.mubr.bf16.mxu1 %v1836_v28 }
 0x279   :  { %822 = vst.msk [vmem:[#allocation3 + $0x18] sm:$0x4] %vm700_vm12, %v820_v29  ;;  %1160 = vmatmul.mubr.bf16.vlgmr.msra.gmra.mxu1 %v1834_v27 }
 0x27a   :  { %811 = vst.msk [vmem:[#allocation3 + $0x18] sm:$0x2] %vm675_vm1, %v809_v30  ;;  %1169 = vmatpush1.bf16.msra.mxu1 %v1837_v25  ;;  %1666 = vmatprep.mubr.msk.bf16.mxu1 %vm544_vm11, %v1841_v35  ;;  %vm1897_vm11 = vmmov 0  }
 0x27b   :  { %1170 = vmatprep.subr.bf16.mxu1 %v1895_v26  ;;  %1744 = vmatprep.mubr.msk.bf16.mxu0 %vm1897_vm11, %v1896_v48 }
 0x27c   :  { %v851_v32 = vpop.permute.xlu1 %850 }
 0x27d   :  { %853 = vst.msk [vmem:[#allocation3 + $0x18] sm:$0x8] %vm746_vm2, %v851_v32 }
 0x27e   :  { %1171 = vmatpush1.bf16.msra.mxu1 %v1838_v31 }
 0x27f   :  { %1172 = vmatprep.subr.bf16.mxu1 %v1895_v26 }
 0x282   :  { %1173 = vmatpush1.bf16.msra.mxu1 %v1839_v33 }
 0x283   :  { %1174 = vmatprep.subr.bf16.mxu1 %v1895_v26 }
 0x284   :  { %v1853_v46 = vld [vmem:[#allocation3 + $0x8] ss:$16 sps:$4 sm:$0xff]  }
 0x286   :  { %1175 = vmatpush1.bf16.msra.mxu1 %v1840_v34 }
 0x287   :  { %1176 = vmatprep.subr.bf16.mxu1 %v1895_v26 }
 0x28a   :  { %1177 = vmatpush1.bf16.msra.mxu1 %v1843_v36 }
 0x28b   :  { %1178 = vmatprep.subr.bf16.mxu1 %v1895_v26 }
 0x28e   :  { %1179 = vmatpush1.bf16.msra.mxu1 %v1844_v37 }
 0x28f   :  { %1180 = vmatprep.subr.bf16.mxu1 %v1895_v26 }
 0x292   :  { %1181 = vmatpush1.bf16.msra.mxu1 %v1845_v38 }
 0x293   :  { %1182 = vmatprep.subr.bf16.mxu1 %v1895_v26 }
 0x296   :  { %1183 = vmatpush1.bf16.msra.mxu1 %v1846_v39 }
 0x297   :  { %1188 = vmatprep.subr.bf16.mxu1 %v1895_v26 }
 0x29a   :  { %1189 = vmatpush2.bf16.msra.mxu1 %v1847_v4 }
 0x29b   :  { %1190 = vmatprep.subr.bf16.mxu1 %v1895_v26 }
 0x29e   :  { %1191 = vmatpush2.bf16.msra.mxu1 %v1848_v40  ;;  %v1680_v40 = vld [vmem:[%s2652_s6] ss:$0 sm:$0xff]  ;;  %s1866_s6 = scalar_lea.vmem %s1584_s11, 32 }
 0x29f   :  { %1192 = vmatprep.subr.bf16.mxu1 %v1895_v26  ;;  %p1867_p0 = scmp.ne.s32.totalorder %s1584_s11, %s1866_s6  ;;  %p1872_p2 = scmp.lt.s32.totalorder %s1866_s6, %s1866_s6 }
 0x2a1   :  { %p1873_p3 = por %p1872_p2, %p1871_p1 }
 0x2a2   :  { %1193 = vmatpush2.bf16.msra.mxu1 %v1849_v41 }
 0x2a3   :  { %1194 = vmatprep.subr.bf16.mxu1 %v1895_v26  ;;  %p1874_p4 = pnand %p1873_p3, %p1867_p0 }
 0x2a6   :  { %1195 = vmatpush2.bf16.msra.mxu1 %v1850_v42 }
 0x2a7   :  { %1196 = vmatprep.subr.bf16.mxu1 %v1895_v26 }
 0x2aa   :  { %1197 = vmatpush2.bf16.msra.mxu1 %v1851_v43 }
 0x2ab   :  { %1198 = vmatprep.subr.bf16.mxu1 %v1895_v26 }
 0x2ae   :  { %1199 = vmatpush2.bf16.msra.mxu1 %v1852_v45 }
 0x2af   :  { %1732 = vmatprep.subr.bf16.mxu1 %v1896_v48 }
 0x2b1   :  { %1201 = vmatmul.mubr.bf16.vlgmr.msra.gmra.mxu1 %v1853_v46 }
 0x2b2   :  { %1733 = vmatpush3.bf16.msra.mxu1 %v1856_v52  ;;  %1736 = vmatprep.mubr.msk.bf16.mxu1 %vm1897_vm11, %v1896_v48 }
 0x2b3   :  { %1734 = vmatprep.subr.bf16.mxu1 %v1896_v48 }
 0x2b6   :  { %1735 = vmatpush3.bf16.msra.mxu1 %v1857_v16 }
 0x339   :  { %v1709_v26 = vpop.f32.mrf.mxu1 }
 0x33b   :  { %v1710_v50 = vpop.f32.mrf.mxu1 }
 0x33c   :  { %v1711_v44 = vadd.f32 %v1710_v50, %v1709_v26 }
 0x33d   :  { %v1712_v51 = vpop.f32.mrf.mxu1 }
 0x33f   :  { %v1713_v53 = vpop.f32.mrf.mxu1 }
 0x340   :  { %v1714_v57 = vadd.f32 %v1713_v53, %v1712_v51 }
 0x371   :  { %v1202_v54 = vpop.f32.mrf.mxu1 }
 0x372   :  { %v1203_v55 = vadd.f32 %v1711_v44, %v1202_v54 }
 0x373   :  { %v1204_v56 = vpop.f32.mrf.mxu1 }
 0x374   :  { %v1211_v58 = vrot.slane %v1203_v55, 2 }
 0x375   :  { %v1205_v24 = vpop.f32.mrf.mxu1 }
 0x376   :  { %v1213_v59 = vmax.f32 %v1203_v55, %v1211_v58  ;;  %v1206_v60 = vadd.f32 %v1714_v57, %v1205_v24 }
 0x377   :  { %v1207_v62 = vpop.f32.mrf.mxu1 }
 0x378   :  { %v1349_v63 = vrot.slane %v1206_v60, 2  ;;  %1215 = vrot.lane.b32.xlu0 %v1213_v59, %s1893_s2 }
 0x37a   :  { %v1351_v0 = vmax.f32 %v1206_v60, %v1349_v63 }
 0x37c   :  { %1353 = vrot.lane.b32.xlu1 %v1351_v0, %s1893_s2 }
 0x3ea   :  { %v1216_v2 = vpop.permute.xlu0 %1215 }
 0x3eb   :  { %v1218_v5 = vmax.f32 %v1213_v59, %v1216_v2 }
 0x3ed   :  { %v1225_v6 = vadd.f32 %v1667_v1, %v1218_v5 }
 0x3ee   :  { %v1354_v61 = vpop.permute.xlu1 %1353 }
 0x3ef   :  { %v1226_v7 = vmax.f32 %v1225_v6, 0.0  ;;  %v1356_v8 = vmax.f32 %v1351_v0, %v1354_v61 }
 0x3f1   :  { %v1227_v11 = vpack.c.bf16 %v1226_v7, %v1226_v7  ;;  %v1357_v12 = vadd.f32 %v1667_v1, %v1356_v8 }
 0x3f3   :  { %v1237_v13 = vrot.slane %v1227_v11, 2  ;;  %1745 = vmatmul.mubr.msk.bf16.vlgmr.msra.gmra.mxu0 %vm516_vm3, %v1227_v11  ;;  %v1358_v3 = vmax.f32 %v1357_v12, 0.0 }
 0x3f4   :  { %1749 = vmatpush3.bf16.msra.mxu0 %v1858_v10  ;;  %1752 = vmatprep.mubr.msk.bf16.mxu0 %vm1897_vm11, %v1896_v48 }
 0x3f5   :  { %1737 = vmatmul.mubr.msk.bf16.vlgmr.msra.gmra.mxu1 %vm516_vm3, %v1237_v13  ;;  %1750 = vmatprep.subr.bf16.mxu0 %v1896_v48  ;;  %v1359_v17 = vpack.c.bf16 %v1358_v3, %v1358_v3 }
 0x3f7   :  { %v1425_v9 = vrot.slane %v1359_v17, 2 }
 0x3f8   :  { %1751 = vmatpush3.bf16.msra.mxu0 %v1859_v14 }
 0x3f9   :  { %1756 = vmatprep.subr.bf16.mxu0 %v1896_v48 }
 0x3fb   :  { %1753 = vmatmul.mubr.msk.bf16.vlgmr.msra.gmra.mxu0 %vm516_vm3, %v1359_v17 }
 0x3fc   :  { %1757 = vmatpush3.bf16.msra.mxu0 %v1860_v15  ;;  %1760 = vmatprep.mubr.msk.bf16.mxu0 %vm1897_vm11, %v1896_v48 }
 0x3fd   :  { %1758 = vmatprep.subr.bf16.mxu0 %v1896_v48 }
 0x400   :  { %1759 = vmatpush3.bf16.msra.mxu0 %v1861_v18 }
 0x401   :  { %1764 = vmatprep.subr.bf16.mxu0 %v1896_v48 }
 0x403   :  { %1761 = vmatmul.mubr.msk.bf16.vlgmr.msra.gmra.mxu0 %vm516_vm3, %v1425_v9  ;;  %vm1527_vm3 = vcmask 408576  }
 0x404   :  { %1772 = vmatprep.mubr.msk.bf16.mxu0 %vm1897_vm11, %v1896_v48  ;;  %1765 = vmatpush3.bf16.msra.mxu0 %v1533_v20 }
 0x405   :  { %1766 = vmatprep.subr.bf16.mxu0 %v1896_v48 }
 0x408   :  { %1767 = vmatpush3.bf16.msra.mxu0 %v1863_v21 }
 0x409   :  { %1768 = vmatprep.subr.bf16.mxu0 %v1896_v48 }
 0x40c   :  { %1769 = vmatpush3.bf16.msra.mxu0 %v1864_v22 }
 0x40d   :  { %1770 = vmatprep.subr.bf16.mxu0 %v1896_v48 }
 0x410   :  { %1771 = vmatpush3.bf16.msra.mxu0 %v1865_v23 }
 0x4b3   :  { %v1342_v25 = vpop.f32.mrf.mxu0 }
 0x4b5   :  { %v1287_v27 = vpop.f32.mrf.mxu1  ;;  %v1746_v28 = vpop.f32.mrf.mxu0 }
 0x4b6   :  { %v1343_v37 = vadd.f32 %v1342_v25, %v1287_v27 }
 0x4b7   :  { %v1738_v29 = vpop.f32.mrf.mxu1  ;;  %v1345_v30 = vpop.f32.mrf.mxu0 }
 0x4b9   :  { %v1290_v31 = vpop.f32.mrf.mxu1  ;;  %v1747_v32 = vpop.f32.mrf.mxu0 }
 0x4bb   :  { %v1739_v33 = vpop.f32.mrf.mxu1  ;;  %v1413_v34 = vpop.f32.mrf.mxu0 }
 0x4bc   :  { %v1419_v39 = vadd.f32 %v1413_v34, %v1343_v37 }
 0x4bd   :  { %v1754_v35 = vpop.f32.mrf.mxu0 }
 0x4bf   :  { %v1416_v36 = vpop.f32.mrf.mxu0 }
 0x4c1   :  { %v1755_v38 = vpop.f32.mrf.mxu0 }
 0x4c3   :  { %v1475_v4 = vpop.f32.mrf.mxu0 }
 0x4c4   :  { %v1481_v41 = vadd.f32 %v1475_v4, %v1419_v39 }
 0x4c5   :  { %v1762_v42 = vpop.f32.mrf.mxu0 }
 0x4c6   :  { %v1489_v43 = vadd.f32 %v1680_v40, %v1481_v41 }
 0x4c7   :  { %v1478_v45 = vpop.f32.mrf.mxu0 }
 0x4c8   :  { %v1490_v46 = vmax.f32 %v1489_v43, 0.0 }
 0x4c9   :  { %v1763_v47 = vpop.f32.mrf.mxu0 }
 0x4ca   :  { %v1491_v48 = vpack.c.bf16 %v1490_v46, %v1490_v46 }
 0x4cc   :  { %1773 = vmatmul.mubr.msk.bf16.vlgmr.msra.gmra.mxu0 %vm1527_vm3, %v1491_v48 }
 0x58c   :  { %v1569_v26 = vpop.f32.mrf.mxu0 }
 0x58d   :  { %v1570_v50 = vadd.f32 %v1681_v49, %v1569_v26 }
 0x58e   :  { %v1774_v51 = vpop.f32.mrf.mxu0 }
 0x58f   :  { %1576 = vst.msk [vmem:[#allocation4] sm:$0x3] %vm1575_vm10, %v1570_v50 }
 0x590   :  { %v1572_v52 = vpop.f32.mrf.mxu0 }
 0x591   :  { %1877 = shalt.err (!%p1874_p4)
}
 0x592   :  { %1586 = dma.vmem_to_hbm [thread:$0]  %s1584_s11, 32, %s2655_s9, [#allocation5]   ;;  %v1775_v53 = vpop.f32.mrf.mxu0 }
 0x593   :  { %1886 = dma.done.wait [#allocation5], 32  }
 0x594   :  { %1887 = vsyncadd [#allocation5], 4294967264 }
 0x595   :  { %1590 = vsyncpa [#allocation5], 1 }

</bundles_post_ra>
